<compile_context>
chip_gen: v7x
topology: tpu7x:2x2x1
jax: 0.10.0
libtpu: 0.0.40
codegen_flags: <defaults>
</compile_context>

<pallas_src>
import functools

import numpy as np
import jax
import jax.numpy as jnp
from jax.experimental import pallas as pl
from jax.experimental.pallas import tpu as pltpu

EPS = 1e-5
KK = 16  # 4x4 kernel positions


# --------------------------- hardware-aware tiling ---------------------------

@functools.lru_cache(maxsize=None)
def _hw_info():
    """(#TensorCores per chip, scoped-VMEM budget in bytes)."""
    try:
        kind = jax.devices()[0].device_kind.lower()
    except Exception:  # pragma: no cover - defensive
        kind = ""
    is_v7 = "v7" in kind
    n_tc = 2 if is_v7 else 1                      # v5e/v6e: single TC
    vmem_budget = (48 << 20) if is_v7 else (100 << 20)
    return n_tc, vmem_budget


def _pick_tm(K, Cout, M, out_itemsize):
    """Full-M tiles on single-TC chips; 2-way split for v7x megacore; shrink
    further only if the (double-buffered) tiles would overflow the VMEM budget."""
    n_tc, vmem_budget = _hw_info()

    def vmem_bytes(tm):
        a = 2 * K * tm * 2                       # double-buffered bf16 A tile
        o = 2 * Cout * tm * out_itemsize         # double-buffered output tile
        w = Cout * K * 2                         # resident bf16 weights
        st = 4 * Cout * 4 * 2                    # stats tiles (tiny)
        return a + o + w + st

    tm = M
    if n_tc > 1 and M % 256 == 0:
        tm = M // 2
    while vmem_bytes(tm) > vmem_budget and tm % 256 == 0:
        tm //= 2
    return tm


# ------------------------------ Pallas kernels ------------------------------

def _conv_mm_kernel(a_ref, w_ref, *out_refs, relu_out, emit_stats):
    """y = W(Cout,K) @ A(K,tm); optional ReLU epilogue; optional per-channel
    sum / sum-of-squares (f32, over this M tile) for the next BatchNorm."""
    y = jnp.dot(w_ref[...], a_ref[...], preferred_element_type=jnp.float32)
    if relu_out:
        y = jnp.maximum(y, 0.0)
    o_ref = out_refs[0]
    o_ref[...] = y.astype(o_ref.dtype)
    if emit_stats:
        out_refs[1][0] = jnp.sum(y, axis=1, keepdims=True)       # (Cout, 1)
        out_refs[2][0] = jnp.sum(y * y, axis=1, keepdims=True)   # (Cout, 1)


def _head_kernel(feat_ref, g_ref, b_ref, w5_ref, col_ref):
    """BN4 (two-pass batch stats) + ReLU + per-position conv5 products.

    feat: (Cout4, M=N*16) f32, w5 tiled N times along M. Output (1, M) holds
    sum_c relu(BN(feat))[c, m] * w5[c, m]; the caller sums each 16-wide group.
    """
    y = feat_ref[...]                                            # (Cout4, M) f32
    mean = jnp.mean(y, axis=1, keepdims=True)
    d = y - mean
    var = jnp.mean(d * d, axis=1, keepdims=True)                 # two-pass: stable
    scale = g_ref[...] * jax.lax.rsqrt(var + EPS)
    e = jnp.maximum(d * scale + b_ref[...], 0.0)                 # (Cout4, M)
    col_ref[...] = jnp.sum(e * w5_ref[...], axis=0, keepdims=True)


# ------------------------------ kernel wrappers -----------------------------

def conv_mm(a, w, *, relu_out=False, emit_stats=False, out_dtype=jnp.float32):
    """a: (K, M) bf16 transposed-im2col patches, w: (Cout, K) bf16 -> (Cout, M)."""
    K, M = a.shape
    Cout, Kw = w.shape
    assert K == Kw
    tm = _pick_tm(K, Cout, M, jnp.dtype(out_dtype).itemsize)
    assert M % tm == 0
    g = M // tm
    _, vmem_budget = _hw_info()

    kernel = functools.partial(_conv_mm_kernel, relu_out=relu_out,
                               emit_stats=emit_stats)

    in_specs = [pl.BlockSpec((K, tm), lambda i: (0, i)),
                pl.BlockSpec((Cout, K), lambda i: (0, 0))]
    y_shape = jax.ShapeDtypeStruct((Cout, M), out_dtype)
    y_spec = pl.BlockSpec((Cout, tm), lambda i: (0, i))
    if emit_stats:
        st_shape = jax.ShapeDtypeStruct((g, Cout, 1), jnp.float32)
        st_spec = pl.BlockSpec((1, Cout, 1), lambda i: (i, 0, 0))
        out_shape = (y_shape, st_shape, st_shape)
        out_specs = (y_spec, st_spec, st_spec)
    else:
        out_shape = y_shape
        out_specs = y_spec

    return pl.pallas_call(
        kernel,
        grid=(g,),
        in_specs=in_specs,
        out_specs=out_specs,
        out_shape=out_shape,
        compiler_params=pltpu.CompilerParams(
            dimension_semantics=("parallel",),
            vmem_limit_bytes=vmem_budget),
    )(a, w)


def conv5_head(feat, gamma4, beta4, w5_tiled):
    Cout, M = feat.shape
    _, vmem_budget = _hw_info()
    full = lambda shp: pl.BlockSpec(shp, lambda i: (0,) * len(shp))
    return pl.pallas_call(
        _head_kernel,
        grid=(1,),
        in_specs=[full((Cout, M)), full((Cout, 1)), full((Cout, 1)),
                  full((Cout, M))],
        out_specs=full((1, M)),
        out_shape=jax.ShapeDtypeStruct((1, M), jnp.float32),
        compiler_params=pltpu.CompilerParams(
            dimension_semantics=("arbitrary",),
            vmem_limit_bytes=vmem_budget),
    )(feat, gamma4, beta4, w5_tiled)


# ------------------------------- JAX glue ----------------------------------

def im2col_t(x_cnhw, k, s, p, out_dtype=jnp.bfloat16):
    """Transposed im2col: (C, N, H, W) -> A (k*k*C, N*Ho*Wo), zero padding.

    K ordering = (ky, kx, c) with c fastest; M ordering = (n, ho, wo).
    """
    C, N, H, W = x_cnhw.shape
    xp = jnp.pad(x_cnhw, ((0, 0), (0, 0), (p, p), (p, p))) if p > 0 else x_cnhw
    Hp, Wp = H + 2 * p, W + 2 * p
    Ho = (Hp - k) // s + 1
    Wo = (Wp - k) // s + 1
    cols = []
    for ky in range(k):
        for kx in range(k):
            cols.append(xp[:, :, ky:ky + (Ho - 1) * s + 1:s,
                              kx:kx + (Wo - 1) * s + 1:s])      # (C, N, Ho, Wo)
    a = jnp.stack(cols, axis=0)                                  # (k*k, C, N, Ho, Wo)
    return a.reshape(k * k * C, N * Ho * Wo).astype(out_dtype), (N, Ho, Wo)


def bn_from_stats(sums, ssqs, gamma, beta, m):
    """Per-channel scale/shift (train-mode batch stats) from kernel-emitted stats."""
    s = jnp.sum(sums, axis=0).reshape(-1)
    q = jnp.sum(ssqs, axis=0).reshape(-1)
    mean = s / m
    # Clamp: E[x^2]-E[x]^2 can go slightly negative in f32 for |mean| >> std.
    var = jnp.maximum(q / m - mean * mean, 0.0)
    scale = gamma * jax.lax.rsqrt(var + EPS)
    shift = beta - mean * scale
    return scale, shift


def bn_relu(y_cm, scale, shift):
    """relu(y*scale+shift) applied ONCE to the (Cout, M) layer output (pre-im2col)."""
    z = y_cm.astype(jnp.float32) * scale[:, None] + shift[:, None]
    return jnp.maximum(z, 0.0).astype(jnp.bfloat16)


def prepare_params(P):
    """Hoisted weight repacking: (Cout,Cin,kh,kw) -> (Cout, kh*kw*Cin) bf16, etc.
    No batch size is baked in."""
    def wmat(w):
        cout = w.shape[0]
        return jnp.transpose(w, (0, 2, 3, 1)).reshape(cout, -1).astype(jnp.bfloat16)

    c5 = P["w5"].shape[1]
    return {
        "w1": wmat(P["w1"]), "w2": wmat(P["w2"]),
        "w3": wmat(P["w3"]), "w4": wmat(P["w4"]),
        "g2": P["g2"].astype(jnp.float32), "b2": P["b2"].astype(jnp.float32),
        "g3": P["g3"].astype(jnp.float32), "b3": P["b3"].astype(jnp.float32),
        "g4": P["g4"].reshape(-1, 1).astype(jnp.float32),
        "b4": P["b4"].reshape(-1, 1).astype(jnp.float32),
        "w5m": P["w5"][0].reshape(c5, KK).astype(jnp.float32),   # (8nf, 16)
    }


def gan_d_forward(x_nchw, W):
    """Returns (output[N], features[N, 8*nf, 4, 4] in NCHW, like PyTorch)."""
    N = x_nchw.shape[0]
    x = jnp.transpose(x_nchw, (1, 0, 2, 3)).astype(jnp.float32)  # (C, N, H, W)

    # conv1 -> ReLU fused in the matmul epilogue; bf16 intermediate.
    a, (n, h, w) = im2col_t(x, 4, 2, 1)
    h1 = conv_mm(a, W["w1"], relu_out=True, out_dtype=jnp.bfloat16)  # (nf, N*32*32)

    # conv2 (raw, bf16) + per-channel batch stats emitted by the kernel.
    a, (n, h, w) = im2col_t(h1.reshape(-1, n, h, w), 4, 2, 1)
    y2, s2, q2 = conv_mm(a, W["w2"], emit_stats=True,
                         out_dtype=jnp.bfloat16)                 # (2nf, N*16*16)
    sc2, sh2 = bn_from_stats(s2, q2, W["g2"], W["b2"], y2.shape[1])

    # BN2+ReLU applied once pre-im2col (XLA elementwise, plain zero padding).
    a, (n, h, w) = im2col_t(bn_relu(y2, sc2, sh2).reshape(-1, n, h, w), 4, 2, 1)
    y3, s3, q3 = conv_mm(a, W["w3"], emit_stats=True,
                         out_dtype=jnp.bfloat16)                 # (4nf, N*8*8)
    sc3, sh3 = bn_from_stats(s3, q3, W["g3"], W["b3"], y3.shape[1])

    # BN3+ReLU pre-im2col, then conv4 -> features (f32, like PyTorch).
    a, (n, h, w) = im2col_t(bn_relu(y3, sc3, sh3).reshape(-1, n, h, w), 4, 2, 1)
    feat_cm = conv_mm(a, W["w4"], out_dtype=jnp.float32)         # (8nf, N*16)

    # Head: BN4 (two-pass batch stats) + ReLU + conv5 per-position products in
    # a tiny kernel; the 16-wide per-image reduction is a trivial XLA sum.
    w5_tiled = jnp.tile(W["w5m"], (1, n))                        # (8nf, N*16)
    col = conv5_head(feat_cm, W["g4"], W["b4"], w5_tiled)        # (1, N*16)
    out = jnp.sum(col.reshape(n, h * w), axis=1)                 # (N,)

    features = jnp.transpose(feat_cm.reshape(-1, n, h, w), (1, 0, 2, 3))  # NCHW
    return out, features


# ------------------------- pure-JAX reference check ------------------------

def _ref_forward(x, P):
    def conv(x, w, s, p):
        return jax.lax.conv_general_dilated(
            x, w, (s, s), [(p, p), (p, p)],
            dimension_numbers=("NCHW", "OIHW", "NCHW"))

    def bn(x, g, b):
        m = jnp.mean(x, axis=(0, 2, 3), keepdims=True)
        v = jnp.mean((x - m) ** 2, axis=(0, 2, 3), keepdims=True)
        return ((x - m) * jax.lax.rsqrt(v + EPS) * g.reshape(1, -1, 1, 1)
                + b.reshape(1, -1, 1, 1))

    x = x.astype(jnp.float32)
    h = jax.nn.relu(conv(x, P["w1"], 2, 1))
    h = jax.nn.relu(bn(conv(h, P["w2"], 2, 1), P["g2"], P["b2"]))
    h = jax.nn.relu(bn(conv(h, P["w3"], 2, 1), P["g3"], P["b3"]))
    feats = conv(h, P["w4"], 2, 1)
    e = jax.nn.relu(bn(feats, P["g4"], P["b4"]))
    out = conv(e, P["w5"], 1, 0).reshape(x.shape[0])
    return out, feats


# --------------------------------- main -------------------------------------

def make_params(key, num_channels, nf):
    ks = jax.random.split(key, 11)

    def w(k, cout, cin):
        return (0.05 * jax.random.normal(k, (cout, cin, 4, 4))).astype(jnp.float32)

    def gb(kg, kb, c):
        return ((1.0 + 0.1 * jax.random.normal(kg, (c,))).astype(jnp.float32),
                (0.1 * jax.random.normal(kb, (c,))).astype(jnp.float32))

    g2, b2 = gb(ks[5], ks[6], nf * 2)
    g3, b3 = gb(ks[7], ks[8], nf * 4)
    g4, b4 = gb(ks[9], ks[10], nf * 8)
    return {
        "w1": w(ks[0], nf, num_channels),
        "w2": w(ks[1], nf * 2, nf), "g2": g2, "b2": b2,
        "w3": w(ks[2], nf * 4, nf * 2), "g3": g3, "b3": b3,
        "w4": w(ks[3], nf * 8, nf * 4), "g4": g4, "b4": b4,
        "w5": w(ks[4], 1, nf * 8),
    }


if __name__ == "__main__":
    # Spatial size must be 64 so the final 4x4 conv yields 1x1 and
    # output.view(batch) is valid, exactly like the PyTorch module.
    B, C, S, NF = 2, 3, 64, 8
    key = jax.random.PRNGKey(0)
    kx, kp = jax.random.split(key)
    x = jax.random.normal(kx, (B, C, S, S), dtype=jnp.float32)   # NCHW like PyTorch
    params = make_params(kp, C, NF)
    prep = prepare_params(params)

    fwd = jax.jit(gan_d_forward)
    out, feats = jax.block_until_ready(fwd(x, prep))

    out_ref, feats_ref = _ref_forward(x, params)
    # Tolerances account for bf16 MXU operands AND bf16 inter-layer activations
    # (accumulation, BN statistics and epilogues remain f32).
    np.testing.assert_allclose(np.asarray(out), np.asarray(out_ref),
                               rtol=8e-2, atol=8e-2)
    np.testing.assert_allclose(np.asarray(feats), np.asarray(feats_ref),
                               rtol=8e-2, atol=8e-2)

    assert out.shape == (B,)
    assert feats.shape == (B, NF * 8, 4, 4)
    print("KERNEL_OK")
</pallas_src>

<mosaic_0001>
module attributes {stable_mosaic.version = 11 : i64} {
  func.func @_conv_mm_kernel(%arg0: i32, %arg1: memref<48x2048xbf16, #tpu.memory_space<vmem>>, %arg2: memref<8x48xbf16, #tpu.memory_space<vmem>>, %arg3: memref<8x2048xbf16, #tpu.memory_space<vmem>>) attributes {dimension_semantics = [#tpu.dimension_semantics<parallel>], iteration_bounds = array<i64: 1>, scalar_prefetch = 0 : i64, scratch_operands = 0 : i64, tpu.core_type = #tpu.core_type<tc>, window_params = [{transform_indices = @transform_0, window_bounds = array<i64: 48, 2048>}, {pipeline_mode = #tpu.pipeline_mode<synchronous>, transform_indices = @transform_1, window_bounds = array<i64: 8, 48>}, {transform_indices = @transform_2, window_bounds = array<i64: 8, 2048>}]} {
    %c0 = arith.constant 0 : index
    %c0_0 = arith.constant 0 : index
    %0 = vector.load %arg2[%c0, %c0_0] : memref<8x48xbf16, #tpu.memory_space<vmem>>, vector<8x48xbf16>
    %c0_1 = arith.constant 0 : index
    %c0_2 = arith.constant 0 : index
    %1 = vector.load %arg1[%c0_1, %c0_2] : memref<48x2048xbf16, #tpu.memory_space<vmem>>, vector<48x2048xbf16>
    %cst = arith.constant dense<0.000000e+00> : vector<8x2048xf32>
    %2 = tpu.matmul %0, %1, %cst {dimension_numbers = #tpu.dot_dimension_numbers<[1], [0], [0], [1], [0, 0, 1, 1], [], []>} : vector<8x48xbf16>, vector<48x2048xbf16>, vector<8x2048xf32> -> vector<8x2048xf32>
    %cst_3 = arith.constant 0.000000e+00 : f32
    %3 = vector.broadcast %cst_3 : f32 to vector<8x2048xf32>
    %4 = arith.maximumf %2, %3 : vector<8x2048xf32>
    %5 = arith.truncf %4 : vector<8x2048xf32> to vector<8x2048xbf16>
    %c0_4 = arith.constant 0 : index
    %c0_5 = arith.constant 0 : index
    %6 = vector.load %arg3[%c0_4, %c0_5] : memref<8x2048xbf16, #tpu.memory_space<vmem>>, vector<8x2048xbf16>
    tpu.vector_store %arg3[%c0_4, %c0_5], %5 {strides = array<i32>} : memref<8x2048xbf16, #tpu.memory_space<vmem>>, vector<8x2048xbf16>,
    return
  }
  func.func @transform_0(%arg0: i32) -> (i32, i32) {
    %c0_i32 = arith.constant 0 : i32
    %c0_i32_0 = arith.constant 0 : i32
    return %c0_i32, %arg0 : i32, i32
  }
  func.func @transform_1(%arg0: i32) -> (i32, i32) {
    %c0_i32 = arith.constant 0 : i32
    %c0_i32_0 = arith.constant 0 : i32
    %c0_i32_1 = arith.constant 0 : i32
    return %c0_i32, %c0_i32_0 : i32, i32
  }
  func.func @transform_2(%arg0: i32) -> (i32, i32) {
    %c0_i32 = arith.constant 0 : i32
    %c0_i32_0 = arith.constant 0 : i32
    return %c0_i32, %arg0 : i32, i32
  }
}

module attributes {stable_mosaic.version = 11 : i64} {
  func.func @_conv_mm_kernel(%arg0: i32, %arg1: memref<128x512xbf16, #tpu.memory_space<vmem>>, %arg2: memref<16x128xbf16, #tpu.memory_space<vmem>>, %arg3: memref<16x512xbf16, #tpu.memory_space<vmem>>, %arg4: memref<1x16x1xf32, #tpu.memory_space<vmem>>, %arg5: memref<1x16x1xf32, #tpu.memory_space<vmem>>) attributes {dimension_semantics = [#tpu.dimension_semantics<parallel>], iteration_bounds = array<i64: 1>, scalar_prefetch = 0 : i64, scratch_operands = 0 : i64, tpu.core_type = #tpu.core_type<tc>, window_params = [{transform_indices = @transform_0, window_bounds = array<i64: 128, 512>}, {pipeline_mode = #tpu.pipeline_mode<synchronous>, transform_indices = @transform_1, window_bounds = array<i64: 16, 128>}, {transform_indices = @transform_2, window_bounds = array<i64: 16, 512>}, {transform_indices = @transform_3, window_bounds = array<i64: 1, 16, 1>}, {transform_indices = @transform_4, window_bounds = array<i64: 1, 16, 1>}]} {
    %c0 = arith.constant 0 : index
    %c0_0 = arith.constant 0 : index
    %0 = vector.load %arg2[%c0, %c0_0] : memref<16x128xbf16, #tpu.memory_space<vmem>>, vector<16x128xbf16>
    %c0_1 = arith.constant 0 : index
    %c0_2 = arith.constant 0 : index
    %1 = vector.load %arg1[%c0_1, %c0_2] : memref<128x512xbf16, #tpu.memory_space<vmem>>, vector<128x512xbf16>
    %cst = arith.constant dense<0.000000e+00> : vector<16x512xf32>
    %2 = tpu.matmul %0, %1, %cst {dimension_numbers = #tpu.dot_dimension_numbers<[1], [0], [0], [1], [0, 0, 1, 1], [], []>} : vector<16x128xbf16>, vector<128x512xbf16>, vector<16x512xf32> -> vector<16x512xf32>
    %3 = arith.truncf %2 : vector<16x512xf32> to vector<16x512xbf16>
    %c0_3 = arith.constant 0 : index
    %c0_4 = arith.constant 0 : index
    %4 = vector.load %arg3[%c0_3, %c0_4] : memref<16x512xbf16, #tpu.memory_space<vmem>>, vector<16x512xbf16>
    tpu.vector_store %arg3[%c0_3, %c0_4], %3 {strides = array<i32>} : memref<16x512xbf16, #tpu.memory_space<vmem>>, vector<16x512xbf16>,
    %cst_5 = arith.constant dense<0.000000e+00> : vector<16xf32>
    %5 = vector.multi_reduction <add>, %2, %cst_5 [1] : vector<16x512xf32> to vector<16xf32>
    %6 = vector.shape_cast %5 : vector<16xf32> to vector<16x1xf32>
    %c0_6 = arith.constant 0 : index
    %c0_7 = arith.constant 0 : index
    %c0_8 = arith.constant 0 : index
    %7 = vector.load %arg4[%c0_6, %c0_7, %c0_8] : memref<1x16x1xf32, #tpu.memory_space<vmem>>, vector<1x16x1xf32>
    %8 = vector.shape_cast %7 : vector<1x16x1xf32> to vector<16x1xf32>
    %9 = vector.shape_cast %6 : vector<16x1xf32> to vector<1x16x1xf32>
    tpu.vector_store %arg4[%c0_6, %c0_7, %c0_8], %9 {strides = array<i32>} : memref<1x16x1xf32, #tpu.memory_space<vmem>>, vector<1x16x1xf32>,
    %10 = arith.mulf %2, %2 : vector<16x512xf32>
    %cst_9 = arith.constant dense<0.000000e+00> : vector<16xf32>
    %11 = vector.multi_reduction <add>, %10, %cst_9 [1] : vector<16x512xf32> to vector<16xf32>
    %12 = vector.shape_cast %11 : vector<16xf32> to vector<16x1xf32>
    %c0_10 = arith.constant 0 : index
    %c0_11 = arith.constant 0 : index
    %c0_12 = arith.constant 0 : index
    %13 = vector.load %arg5[%c0_10, %c0_11, %c0_12] : memref<1x16x1xf32, #tpu.memory_space<vmem>>, vector<1x16x1xf32>
    %14 = vector.shape_cast %13 : vector<1x16x1xf32> to vector<16x1xf32>
    %15 = vector.shape_cast %12 : vector<16x1xf32> to vector<1x16x1xf32>
    tpu.vector_store %arg5[%c0_10, %c0_11, %c0_12], %15 {strides = array<i32>} : memref<1x16x1xf32, #tpu.memory_space<vmem>>, vector<1x16x1xf32>,
    return
  }
  func.func @transform_0(%arg0: i32) -> (i32, i32) {
    %c0_i32 = arith.constant 0 : i32
    %c0_i32_0 = arith.constant 0 : i32
    return %c0_i32, %arg0 : i32, i32
  }
  func.func @transform_1(%arg0: i32) -> (i32, i32) {
    %c0_i32 = arith.constant 0 : i32
    %c0_i32_0 = arith.constant 0 : i32
    %c0_i32_1 = arith.constant 0 : i32
    return %c0_i32, %c0_i32_0 : i32, i32
  }
  func.func @transform_2(%arg0: i32) -> (i32, i32) {
    %c0_i32 = arith.constant 0 : i32
    %c0_i32_0 = arith.constant 0 : i32
    return %c0_i32, %arg0 : i32, i32
  }
  func.func @transform_3(%arg0: i32) -> (i32, i32, i32) {
    %c0_i32 = arith.constant 0 : i32
    %c0_i32_0 = arith.constant 0 : i32
    %c0_i32_1 = arith.constant 0 : i32
    return %arg0, %c0_i32, %c0_i32_0 : i32, i32, i32
  }
  func.func @transform_4(%arg0: i32) -> (i32, i32, i32) {
    %c0_i32 = arith.constant 0 : i32
    %c0_i32_0 = arith.constant 0 : i32
    %c0_i32_1 = arith.constant 0 : i32
    return %arg0, %c0_i32, %c0_i32_0 : i32, i32, i32
  }
}

module attributes {stable_mosaic.version = 11 : i64} {
  func.func @_conv_mm_kernel(%arg0: i32, %arg1: memref<256x128xbf16, #tpu.memory_space<vmem>>, %arg2: memref<32x256xbf16, #tpu.memory_space<vmem>>, %arg3: memref<32x128xbf16, #tpu.memory_space<vmem>>, %arg4: memref<1x32x1xf32, #tpu.memory_space<vmem>>, %arg5: memref<1x32x1xf32, #tpu.memory_space<vmem>>) attributes {dimension_semantics = [#tpu.dimension_semantics<parallel>], iteration_bounds = array<i64: 1>, scalar_prefetch = 0 : i64, scratch_operands = 0 : i64, tpu.core_type = #tpu.core_type<tc>, window_params = [{transform_indices = @transform_0, window_bounds = array<i64: 256, 128>}, {pipeline_mode = #tpu.pipeline_mode<synchronous>, transform_indices = @transform_1, window_bounds = array<i64: 32, 256>}, {transform_indices = @transform_2, window_bounds = array<i64: 32, 128>}, {transform_indices = @transform_3, window_bounds = array<i64: 1, 32, 1>}, {transform_indices = @transform_4, window_bounds = array<i64: 1, 32, 1>}]} {
    %c0 = arith.constant 0 : index
    %c0_0 = arith.constant 0 : index
    %0 = vector.load %arg2[%c0, %c0_0] : memref<32x256xbf16, #tpu.memory_space<vmem>>, vector<32x256xbf16>
    %c0_1 = arith.constant 0 : index
    %c0_2 = arith.constant 0 : index
    %1 = vector.load %arg1[%c0_1, %c0_2] : memref<256x128xbf16, #tpu.memory_space<vmem>>, vector<256x128xbf16>
    %cst = arith.constant dense<0.000000e+00> : vector<32x128xf32>
    %2 = tpu.matmul %0, %1, %cst {dimension_numbers = #tpu.dot_dimension_numbers<[1], [0], [0], [1], [0, 0, 1, 1], [], []>} : vector<32x256xbf16>, vector<256x128xbf16>, vector<32x128xf32> -> vector<32x128xf32>
    %3 = arith.truncf %2 : vector<32x128xf32> to vector<32x128xbf16>
    %c0_3 = arith.constant 0 : index
    %c0_4 = arith.constant 0 : index
    %4 = vector.load %arg3[%c0_3, %c0_4] : memref<32x128xbf16, #tpu.memory_space<vmem>>, vector<32x128xbf16>
    tpu.vector_store %arg3[%c0_3, %c0_4], %3 {strides = array<i32>} : memref<32x128xbf16, #tpu.memory_space<vmem>>, vector<32x128xbf16>,
    %cst_5 = arith.constant dense<0.000000e+00> : vector<32xf32>
    %5 = vector.multi_reduction <add>, %2, %cst_5 [1] : vector<32x128xf32> to vector<32xf32>
    %6 = vector.shape_cast %5 : vector<32xf32> to vector<32x1xf32>
    %c0_6 = arith.constant 0 : index
    %c0_7 = arith.constant 0 : index
    %c0_8 = arith.constant 0 : index
    %7 = vector.load %arg4[%c0_6, %c0_7, %c0_8] : memref<1x32x1xf32, #tpu.memory_space<vmem>>, vector<1x32x1xf32>
    %8 = vector.shape_cast %7 : vector<1x32x1xf32> to vector<32x1xf32>
    %9 = vector.shape_cast %6 : vector<32x1xf32> to vector<1x32x1xf32>
    tpu.vector_store %arg4[%c0_6, %c0_7, %c0_8], %9 {strides = array<i32>} : memref<1x32x1xf32, #tpu.memory_space<vmem>>, vector<1x32x1xf32>,
    %10 = arith.mulf %2, %2 : vector<32x128xf32>
    %cst_9 = arith.constant dense<0.000000e+00> : vector<32xf32>
    %11 = vector.multi_reduction <add>, %10, %cst_9 [1] : vector<32x128xf32> to vector<32xf32>
    %12 = vector.shape_cast %11 : vector<32xf32> to vector<32x1xf32>
    %c0_10 = arith.constant 0 : index
    %c0_11 = arith.constant 0 : index
    %c0_12 = arith.constant 0 : index
    %13 = vector.load %arg5[%c0_10, %c0_11, %c0_12] : memref<1x32x1xf32, #tpu.memory_space<vmem>>, vector<1x32x1xf32>
    %14 = vector.shape_cast %13 : vector<1x32x1xf32> to vector<32x1xf32>
    %15 = vector.shape_cast %12 : vector<32x1xf32> to vector<1x32x1xf32>
    tpu.vector_store %arg5[%c0_10, %c0_11, %c0_12], %15 {strides = array<i32>} : memref<1x32x1xf32, #tpu.memory_space<vmem>>, vector<1x32x1xf32>,
    return
  }
  func.func @transform_0(%arg0: i32) -> (i32, i32) {
    %c0_i32 = arith.constant 0 : i32
    %c0_i32_0 = arith.constant 0 : i32
    return %c0_i32, %arg0 : i32, i32
  }
  func.func @transform_1(%arg0: i32) -> (i32, i32) {
    %c0_i32 = arith.constant 0 : i32
    %c0_i32_0 = arith.constant 0 : i32
    %c0_i32_1 = arith.constant 0 : i32
    return %c0_i32, %c0_i32_0 : i32, i32
  }
  func.func @transform_2(%arg0: i32) -> (i32, i32) {
    %c0_i32 = arith.constant 0 : i32
    %c0_i32_0 = arith.constant 0 : i32
    return %c0_i32, %arg0 : i32, i32
  }
  func.func @transform_3(%arg0: i32) -> (i32, i32, i32) {
    %c0_i32 = arith.constant 0 : i32
    %c0_i32_0 = arith.constant 0 : i32
    %c0_i32_1 = arith.constant 0 : i32
    return %arg0, %c0_i32, %c0_i32_0 : i32, i32, i32
  }
  func.func @transform_4(%arg0: i32) -> (i32, i32, i32) {
    %c0_i32 = arith.constant 0 : i32
    %c0_i32_0 = arith.constant 0 : i32
    %c0_i32_1 = arith.constant 0 : i32
    return %arg0, %c0_i32, %c0_i32_0 : i32, i32, i32
  }
}

module attributes {stable_mosaic.version = 11 : i64} {
  func.func @_conv_mm_kernel(%arg0: i32, %arg1: memref<512x32xbf16, #tpu.memory_space<vmem>>, %arg2: memref<64x512xbf16, #tpu.memory_space<vmem>>, %arg3: memref<64x32xf32, #tpu.memory_space<vmem>>) attributes {dimension_semantics = [#tpu.dimension_semantics<parallel>], iteration_bounds = array<i64: 1>, scalar_prefetch = 0 : i64, scratch_operands = 0 : i64, tpu.core_type = #tpu.core_type<tc>, window_params = [{transform_indices = @transform_0, window_bounds = array<i64: 512, 32>}, {pipeline_mode = #tpu.pipeline_mode<synchronous>, transform_indices = @transform_1, window_bounds = array<i64: 64, 512>}, {transform_indices = @transform_2, window_bounds = array<i64: 64, 32>}]} {
    %c0 = arith.constant 0 : index
    %c0_0 = arith.constant 0 : index
    %0 = vector.load %arg2[%c0, %c0_0] : memref<64x512xbf16, #tpu.memory_space<vmem>>, vector<64x512xbf16>
    %c0_1 = arith.constant 0 : index
    %c0_2 = arith.constant 0 : index
    %1 = vector.load %arg1[%c0_1, %c0_2] : memref<512x32xbf16, #tpu.memory_space<vmem>>, vector<512x32xbf16>
    %cst = arith.constant dense<0.000000e+00> : vector<64x32xf32>
    %2 = tpu.matmul %0, %1, %cst {dimension_numbers = #tpu.dot_dimension_numbers<[1], [0], [0], [1], [0, 0, 1, 1], [], []>} : vector<64x512xbf16>, vector<512x32xbf16>, vector<64x32xf32> -> vector<64x32xf32>
    %c0_3 = arith.constant 0 : index
    %c0_4 = arith.constant 0 : index
    %3 = vector.load %arg3[%c0_3, %c0_4] : memref<64x32xf32, #tpu.memory_space<vmem>>, vector<64x32xf32>
    tpu.vector_store %arg3[%c0_3, %c0_4], %2 {strides = array<i32>} : memref<64x32xf32, #tpu.memory_space<vmem>>, vector<64x32xf32>,
    return
  }
  func.func @transform_0(%arg0: i32) -> (i32, i32) {
    %c0_i32 = arith.constant 0 : i32
    %c0_i32_0 = arith.constant 0 : i32
    return %c0_i32, %arg0 : i32, i32
  }
  func.func @transform_1(%arg0: i32) -> (i32, i32) {
    %c0_i32 = arith.constant 0 : i32
    %c0_i32_0 = arith.constant 0 : i32
    %c0_i32_1 = arith.constant 0 : i32
    return %c0_i32, %c0_i32_0 : i32, i32
  }
  func.func @transform_2(%arg0: i32) -> (i32, i32) {
    %c0_i32 = arith.constant 0 : i32
    %c0_i32_0 = arith.constant 0 : i32
    return %c0_i32, %arg0 : i32, i32
  }
}

module attributes {stable_mosaic.version = 11 : i64} {
  func.func @_head_kernel(%arg0: i32, %arg1: memref<64x32xf32, #tpu.memory_space<vmem>>, %arg2: memref<64x1xf32, #tpu.memory_space<vmem>>, %arg3: memref<64x1xf32, #tpu.memory_space<vmem>>, %arg4: memref<64x32xf32, #tpu.memory_space<vmem>>, %arg5: memref<1x32xf32, #tpu.memory_space<vmem>>) attributes {dimension_semantics = [#tpu.dimension_semantics<arbitrary>], iteration_bounds = array<i64: 1>, scalar_prefetch = 0 : i64, scratch_operands = 0 : i64, tpu.core_type = #tpu.core_type<tc>, window_params = [{pipeline_mode = #tpu.pipeline_mode<synchronous>, transform_indices = @transform_0, window_bounds = array<i64: 64, 32>}, {pipeline_mode = #tpu.pipeline_mode<synchronous>, transform_indices = @transform_1, window_bounds = array<i64: 64, 1>}, {pipeline_mode = #tpu.pipeline_mode<synchronous>, transform_indices = @transform_2, window_bounds = array<i64: 64, 1>}, {pipeline_mode = #tpu.pipeline_mode<synchronous>, transform_indices = @transform_3, window_bounds = array<i64: 64, 32>}, {pipeline_mode = #tpu.pipeline_mode<synchronous>, transform_indices = @transform_4, window_bounds = array<i64: 1, 32>}]} {
    %c0 = arith.constant 0 : index
    %c0_0 = arith.constant 0 : index
    %0 = vector.load %arg1[%c0, %c0_0] : memref<64x32xf32, #tpu.memory_space<vmem>>, vector<64x32xf32>
    %cst = arith.constant dense<0.000000e+00> : vector<64xf32>
    %1 = vector.multi_reduction <add>, %0, %cst [1] : vector<64x32xf32> to vector<64xf32>
    %2 = vector.shape_cast %1 : vector<64xf32> to vector<64x1xf32>
    %cst_1 = arith.constant 3.200000e+01 : f32
    %3 = vector.broadcast %cst_1 : f32 to vector<64x1xf32>
    %4 = arith.divf %2, %3 : vector<64x1xf32>
    %5 = vector.broadcast %4 : vector<64x1xf32> to vector<64x32xf32>
    %6 = arith.subf %0, %5 : vector<64x32xf32>
    %7 = arith.mulf %6, %6 : vector<64x32xf32>
    %cst_2 = arith.constant dense<0.000000e+00> : vector<64xf32>
    %8 = vector.multi_reduction <add>, %7, %cst_2 [1] : vector<64x32xf32> to vector<64xf32>
    %9 = vector.shape_cast %8 : vector<64xf32> to vector<64x1xf32>
    %cst_3 = arith.constant 3.200000e+01 : f32
    %10 = vector.broadcast %cst_3 : f32 to vector<64x1xf32>
    %11 = arith.divf %9, %10 : vector<64x1xf32>
    %c0_4 = arith.constant 0 : index
    %c0_5 = arith.constant 0 : index
    %12 = vector.load %arg2[%c0_4, %c0_5] : memref<64x1xf32, #tpu.memory_space<vmem>>, vector<64x1xf32>
    %cst_6 = arith.constant 9.99999974E-6 : f32
    %13 = vector.broadcast %cst_6 : f32 to vector<64x1xf32>
    %14 = arith.addf %11, %13 : vector<64x1xf32>
    %15 = math.rsqrt %14 : vector<64x1xf32>
    %16 = arith.mulf %12, %15 : vector<64x1xf32>
    %17 = vector.broadcast %16 : vector<64x1xf32> to vector<64x32xf32>
    %18 = arith.mulf %6, %17 : vector<64x32xf32>
    %c0_7 = arith.constant 0 : index
    %c0_8 = arith.constant 0 : index
    %19 = vector.load %arg3[%c0_7, %c0_8] : memref<64x1xf32, #tpu.memory_space<vmem>>, vector<64x1xf32>
    %20 = vector.broadcast %19 : vector<64x1xf32> to vector<64x32xf32>
    %21 = arith.addf %18, %20 : vector<64x32xf32>
    %cst_9 = arith.constant 0.000000e+00 : f32
    %22 = vector.broadcast %cst_9 : f32 to vector<64x32xf32>
    %23 = arith.maximumf %21, %22 : vector<64x32xf32>
    %c0_10 = arith.constant 0 : index
    %c0_11 = arith.constant 0 : index
    %24 = vector.load %arg4[%c0_10, %c0_11] : memref<64x32xf32, #tpu.memory_space<vmem>>, vector<64x32xf32>
    %25 = arith.mulf %23, %24 : vector<64x32xf32>
    %cst_12 = arith.constant dense<0.000000e+00> : vector<32xf32>
    %26 = vector.multi_reduction <add>, %25, %cst_12 [0] : vector<64x32xf32> to vector<32xf32>
    %27 = vector.shape_cast %26 : vector<32xf32> to vector<1x32xf32>
    %c0_13 = arith.constant 0 : index
    %c0_14 = arith.constant 0 : index
    %28 = vector.load %arg5[%c0_13, %c0_14] : memref<1x32xf32, #tpu.memory_space<vmem>>, vector<1x32xf32>
    tpu.vector_store %arg5[%c0_13, %c0_14], %27 {strides = array<i32>} : memref<1x32xf32, #tpu.memory_space<vmem>>, vector<1x32xf32>,
    return
  }
  func.func @transform_0(%arg0: i32) -> (i32, i32) {
    %c0_i32 = arith.constant 0 : i32
    %c0_i32_0 = arith.constant 0 : i32
    %c0_i32_1 = arith.constant 0 : i32
    return %c0_i32, %c0_i32_0 : i32, i32
  }
  func.func @transform_1(%arg0: i32) -> (i32, i32) {
    %c0_i32 = arith.constant 0 : i32
    %c0_i32_0 = arith.constant 0 : i32
    %c0_i32_1 = arith.constant 0 : i32
    return %c0_i32, %c0_i32_0 : i32, i32
  }
  func.func @transform_2(%arg0: i32) -> (i32, i32) {
    %c0_i32 = arith.constant 0 : i32
    %c0_i32_0 = arith.constant 0 : i32
    %c0_i32_1 = arith.constant 0 : i32
    return %c0_i32, %c0_i32_0 : i32, i32
  }
  func.func @transform_3(%arg0: i32) -> (i32, i32) {
    %c0_i32 = arith.constant 0 : i32
    %c0_i32_0 = arith.constant 0 : i32
    %c0_i32_1 = arith.constant 0 : i32
    return %c0_i32, %c0_i32_0 : i32, i32
  }
  func.func @transform_4(%arg0: i32) -> (i32, i32) {
    %c0_i32 = arith.constant 0 : i32
    %c0_i32_0 = arith.constant 0 : i32
    %c0_i32_1 = arith.constant 0 : i32
    return %c0_i32, %c0_i32_0 : i32, i32
  }
}

</mosaic_0001>

<bundles_post_ra>
// kernel: gan_d_forward.5
= control target key start
LH: loop header
LB: loop body
LE: loop exit
PB: predicated region body
PF: predicated region fallthrough
CT: control target
= control target key end

     0   :  { %7 = vsyncpa [#allocation3], 0  ;;  %s997_s0 = inlined_call_operand.hbm [shape: bf16[48,2048], index: 0, kind: input, shape index: {}]   ;;  %s998_s1 = inlined_call_operand.hbm [shape: bf16[8,48], index: 1, kind: input, shape index: {}]   ;;  %s999_s2 = inlined_call_operand.hbm [shape: bf16[8,2048], index: 2, kind: output, shape index: {}]  }
   0x1   :  { %8 = vsyncpa [#allocation6], 0 }
   0x2   :  { %9 = vsyncpa [#allocation4], 0  ;;  %s914_s9 = smov [#allocation2]   ;;  %s842_s13 = scalar_lea.hbm %s997_s0, 6144 }
   0x3   :  { %s15_s10 = sshll.u32 %s914_s9, 4  ;;  %p843_p0 = scmp.ne.s32.totalorder %s997_s0, %s842_s13  ;;  %s16_s10 = int_to_ptr.vmem [resolvable:$true] %s15_s10 }
   0x4   :  { %p846_p1 = scmp.lt.u32.totalorder %s842_s13, %s997_s0 }
   0x6   :  { %p848_p2 = pnand %p846_p1, %p843_p0 }
   0x8   :  { %851 = shalt.err (!%p848_p2)
}
   0x9   :  { %s852_s18 = scalar_lea.vmem %s16_s10, 6144  ;;  %p857_p4 = scmp.lt.s32.totalorder %s16_s10, %s16_s10 }
   0xa   :  { %p853_p3 = scmp.ne.s32.totalorder %s16_s10, %s852_s18  ;;  %p858_p5 = scmp.lt.s32.totalorder %s852_s18, %s852_s18 }
   0xc   :  { %p859_p6 = por %p858_p5, %p857_p4 }
   0xe   :  { %p860_p7 = pnand %p859_p6, %p853_p3 }
  0x10   :  { %863 = shalt.err (!%p860_p7)
}
  0x11   :  { %s915_s19 = smov 1024   ;;  %s916_s20 = smov 64  }
  0x12   :  { %21 = dma.hbm_to_vmem [thread:$0]  %s997_s0, 6144, %s16_s10, [#allocation3], %s915_s19, %s915_s19, %s916_s20  }
  0x13   :  { %s917_s23 = smov [#allocation5]   ;;  %s864_s27 = scalar_lea.hbm %s998_s1, 64 }
  0x14   :  { %s28_s24 = sshll.u32 %s917_s23, 4  ;;  %p865_p8 = scmp.ne.s32.totalorder %s998_s1, %s864_s27  ;;  %s29_s24 = int_to_ptr.vmem [resolvable:$true] %s28_s24 }
  0x15   :  { %p868_p9 = scmp.lt.u32.totalorder %s864_s27, %s998_s1 }
  0x17   :  { %p870_p10 = pnand %p868_p9, %p865_p8 }
  0x19   :  { %873 = shalt.err (!%p870_p10)
}
  0x1a   :  { %s874_s4 = scalar_lea.vmem %s29_s24, 64  ;;  %p879_p12 = scmp.lt.s32.totalorder %s29_s24, %s29_s24 }
  0x1b   :  { %p875_p11 = scmp.ne.s32.totalorder %s29_s24, %s874_s4  ;;  %p880_p13 = scmp.lt.s32.totalorder %s874_s4, %s874_s4 }
  0x1d   :  { %p881_p0 = por %p880_p13, %p879_p12 }
  0x1f   :  { %p882_p1 = pnand %p881_p0, %p875_p11 }
  0x21   :  { %885 = shalt.err (!%p882_p1)
}
  0x22   :  { %31 = dma.hbm_to_vmem [thread:$0]  %s998_s1, 64, %s29_s24, [#allocation6]  }
  0x23   :  { %908 = dma.done.wait [#allocation3], 6144  }
  0x24   :  { %909 = vsyncadd [#allocation3], 4294961152 }
  0x25   :  { %910 = dma.done.wait [#allocation6], 64  }
  0x26   :  { %911 = vsyncadd [#allocation6], 4294967232  ;;  %v918_v0 = vmov 0   ;;  %v40_v1 = vld [vmem:[#allocation2] sm:$0xff]  ;;  %v41_v3 = vld [vmem:[#allocation2 + $0x8] sm:$0xff]  ;;  %vm328_vm0 = vcmask 392192  }
  0x27   :  { %364 = vmatprep.mubr.bf16.mxu0 %v918_v0  ;;  %405 = vmatprep.mubr.bf16.mxu1 %v918_v0  ;;  %v48_v2 = vld [vmem:[#allocation2 + $0x40] sm:$0xff]  ;;  %v49_v5 = vld [vmem:[#allocation2 + $0x48] sm:$0xff]  ;;  %v42_v23 = vld [vmem:[#allocation2 + $0x10] sm:$0xff]  ;;  %s919_s1 = smov [#allocation7]  }
  0x28   :  { %v765_v4 = vcombine.high %v40_v1, %v48_v2  ;;  %v764_v6 = vcombine.low %v40_v1, %v48_v2  ;;  %v56_v7 = vld [vmem:[#allocation2 + $0x80] sm:$0xff]  ;;  %v767_v9 = vcombine.high %v41_v3, %v49_v5  ;;  %v766_v10 = vcombine.low %v41_v3, %v49_v5  ;;  %v57_v12 = vld [vmem:[#allocation2 + $0x88] sm:$0xff]  ;;  %v50_v24 = vld [vmem:[#allocation2 + $0x50] sm:$0xff]  ;;  %s754_s6 = sshll.u32 %s919_s1, 4  ;;  %s755_s6 = int_to_ptr.vmem [resolvable:$true] %s754_s6 }
  0x29   :  { %v64_v8 = vld [vmem:[#allocation2 + $0xc0] sm:$0xff]  ;;  %v65_v13 = vld [vmem:[#allocation2 + $0xc8] sm:$0xff]  ;;  %v43_v25 = vld [vmem:[#allocation2 + $0x18] sm:$0xff]  ;;  %v769_v29 = vcombine.high %v42_v23, %v50_v24  ;;  %v768_v36 = vcombine.low %v42_v23, %v50_v24  ;;  %s886_s7 = scalar_lea.vmem %s755_s6, 1024  ;;  %p891_p3 = scmp.lt.s32.totalorder %s755_s6, %s755_s6 }
  0x2a   :  { %v781_v11 = vcombine.high %v56_v7, %v64_v8  ;;  %v72_v14 = vld [vmem:[#allocation2 + $0x100] sm:$0xff]  ;;  %332 = vmatprep.subr.bf16.mxu0 %v765_v4  ;;  %v783_v15 = vcombine.high %v57_v12, %v65_v13  ;;  %v73_v17 = vld [vmem:[#allocation2 + $0x108] sm:$0xff]  ;;  %373 = vmatprep.subr.bf16.mxu1 %v767_v9  ;;  %v780_v19 = vcombine.low %v56_v7, %v64_v8  ;;  %v51_v26 = vld [vmem:[#allocation2 + $0x58] sm:$0xff]  ;;  %p887_p2 = scmp.ne.s32.totalorder %s755_s6, %s886_s7  ;;  %p892_p4 = scmp.lt.s32.totalorder %s886_s7, %s886_s7 }
  0x2b   :  { %v80_v16 = vld [vmem:[#allocation2 + $0x140] sm:$0xff]  ;;  %v81_v18 = vld [vmem:[#allocation2 + $0x148] sm:$0xff]  ;;  %333 = vmatpush1.bf16.msra.mxu0 %v764_v6  ;;  %374 = vmatpush1.bf16.msra.mxu1 %v766_v10  ;;  %v782_v20 = vcombine.low %v57_v12, %v65_v13  ;;  %v771_v30 = vcombine.high %v43_v25, %v51_v26  ;;  %v58_v31 = vld [vmem:[#allocation2 + $0x90] sm:$0xff]  ;;  %v770_v37 = vcombine.low %v43_v25, %v51_v26 }
  0x2c   :  { %334 = vmatprep.subr.bf16.mxu0 %v781_v11  ;;  %v797_v21 = vcombine.high %v72_v14, %v80_v16  ;;  %375 = vmatprep.subr.bf16.mxu1 %v783_v15  ;;  %v799_v22 = vcombine.high %v73_v17, %v81_v18  ;;  %v796_v27 = vcombine.low %v72_v14, %v80_v16  ;;  %v66_v32 = vld [vmem:[#allocation2 + $0xd0] sm:$0xff]  ;;  %v59_v33 = vld [vmem:[#allocation2 + $0x98] sm:$0xff]  ;;  %v961_v35 = vld [vmem:[#allocation5] sm:$0xf]  ;;  %p893_p5 = por %p892_p4, %p891_p3 }
  0x2d   :  { %v798_v28 = vcombine.low %v73_v17, %v81_v18  ;;  %v67_v34 = vld [vmem:[#allocation2 + $0xd8] sm:$0xff]  ;;  %v785_v38 = vcombine.high %v58_v31, %v66_v32  ;;  %v74_v40 = vld [vmem:[#allocation2 + $0x110] sm:$0xff]  ;;  %v784_v44 = vcombine.low %v58_v31, %v66_v32  ;;  %v44_v48 = vld [vmem:[#allocation2 + $0x20] sm:$0xff] }
  0x2e   :  { %v787_v39 = vcombine.high %v59_v33, %v67_v34  ;;  %v82_v41 = vld [vmem:[#allocation2 + $0x150] sm:$0xff]  ;;  %v75_v42 = vld [vmem:[#allocation2 + $0x118] sm:$0xff]  ;;  %v786_v45 = vcombine.low %v59_v33, %v67_v34  ;;  %v52_v49 = vld [vmem:[#allocation2 + $0x60] sm:$0xff]  ;;  %p894_p6 = pnand %p893_p5, %p887_p2 }
  0x2f   :  { %335 = vmatpush1.bf16.msra.mxu0 %v780_v19  ;;  %376 = vmatpush1.bf16.msra.mxu1 %v782_v20  ;;  %v83_v43 = vld [vmem:[#allocation2 + $0x158] sm:$0xff]  ;;  %v801_v46 = vcombine.high %v74_v40, %v82_v41  ;;  %v45_v50 = vld [vmem:[#allocation2 + $0x28] sm:$0xff]  ;;  %v800_v52 = vcombine.low %v74_v40, %v82_v41  ;;  %v773_v54 = vcombine.high %v44_v48, %v52_v49  ;;  %v60_v56 = vld [vmem:[#allocation2 + $0xa0] sm:$0xff] }
  0x30   :  { %336 = vmatprep.subr.bf16.mxu0 %v797_v21  ;;  %377 = vmatprep.subr.bf16.mxu1 %v799_v22  ;;  %v803_v47 = vcombine.high %v75_v42, %v83_v43  ;;  %v53_v51 = vld [vmem:[#allocation2 + $0x68] sm:$0xff]  ;;  %v802_v53 = vcombine.low %v75_v42, %v83_v43  ;;  %v68_v57 = vld [vmem:[#allocation2 + $0xe0] sm:$0xff]  ;;  %v772_v60 = vcombine.low %v44_v48, %v52_v49  ;;  %v46_v9 = vld [vmem:[#allocation2 + $0x30] sm:$0xff] }
  0x31   :  { %v775_v55 = vcombine.high %v45_v50, %v53_v51  ;;  %v61_v58 = vld [vmem:[#allocation2 + $0xa8] sm:$0xff]  ;;  %v774_v61 = vcombine.low %v45_v50, %v53_v51  ;;  %v789_v62 = vcombine.high %v60_v56, %v68_v57  ;;  %v76_v1 = vld [vmem:[#allocation2 + $0x120] sm:$0xff]  ;;  %v788_v5 = vcombine.low %v60_v56, %v68_v57  ;;  %v54_v10 = vld [vmem:[#allocation2 + $0x70] sm:$0xff] }
  0x32   :  { %v69_v59 = vld [vmem:[#allocation2 + $0xe8] sm:$0xff]  ;;  %v84_v2 = vld [vmem:[#allocation2 + $0x160] sm:$0xff]  ;;  %v47_v11 = vld [vmem:[#allocation2 + $0x38] sm:$0xff]  ;;  %v777_v15 = vcombine.high %v46_v9, %v54_v10  ;;  %v776_v21 = vcombine.low %v46_v9, %v54_v10 }
  0x33   :  { %337 = vmatpush1.bf16.msra.mxu0 %v796_v27  ;;  %378 = vmatpush1.bf16.msra.mxu1 %v798_v28  ;;  %v791_v63 = vcombine.high %v61_v58, %v69_v59  ;;  %v77_v3 = vld [vmem:[#allocation2 + $0x128] sm:$0xff]  ;;  %v790_v6 = vcombine.low %v61_v58, %v69_v59  ;;  %v805_v7 = vcombine.high %v76_v1, %v84_v2  ;;  %v55_v12 = vld [vmem:[#allocation2 + $0x78] sm:$0xff]  ;;  %v62_v17 = vld [vmem:[#allocation2 + $0xb0] sm:$0xff] }
  0x34   :  { %414 = vmatprep.subr.bf16.mxu0 %v769_v29  ;;  %455 = vmatprep.subr.bf16.mxu1 %v771_v30  ;;  %v85_v4 = vld [vmem:[#allocation2 + $0x168] sm:$0xff]  ;;  %v804_v13 = vcombine.low %v76_v1, %v84_v2  ;;  %v779_v16 = vcombine.high %v47_v11, %v55_v12  ;;  %v70_v18 = vld [vmem:[#allocation2 + $0xf0] sm:$0xff]  ;;  %v63_v19 = vld [vmem:[#allocation2 + $0xb8] sm:$0xff]  ;;  %v778_v22 = vcombine.low %v47_v11, %v55_v12 }
  0x35   :  { %v807_v8 = vcombine.high %v77_v3, %v85_v4  ;;  %v806_v14 = vcombine.low %v77_v3, %v85_v4  ;;  %v71_v20 = vld [vmem:[#allocation2 + $0xf8] sm:$0xff]  ;;  %v793_v23 = vcombine.high %v62_v17, %v70_v18  ;;  %v78_v25 = vld [vmem:[#allocation2 + $0x130] sm:$0xff]  ;;  %v792_v29 = vcombine.low %v62_v17, %v70_v18 }
  0x36   :  { %812 = vmatmul.mubr.msk.bf16.vlgmr.msra.gmra.mrb[0].mxu0 %vm328_vm0, %v961_v35  ;;  %813 = vmatmul.mubr.msk.bf16.vlgmr.msra.gmra.mrb[0].mxu1 %vm328_vm0, %v961_v35  ;;  %v795_v24 = vcombine.high %v63_v19, %v71_v20  ;;  %v86_v26 = vld [vmem:[#allocation2 + $0x170] sm:$0xff]  ;;  %v79_v27 = vld [vmem:[#allocation2 + $0x138] sm:$0xff]  ;;  %v794_v30 = vcombine.low %v63_v19, %v71_v20 }
  0x37   :  { %415 = vmatpush1.bf16.msra.mxu0 %v768_v36  ;;  %456 = vmatpush1.bf16.msra.mxu1 %v770_v37  ;;  %v87_v28 = vld [vmem:[#allocation2 + $0x178] sm:$0xff]  ;;  %v809_v31 = vcombine.high %v78_v25, %v86_v26  ;;  %v808_v33 = vcombine.low %v78_v25, %v86_v26 }
  0x38   :  { %416 = vmatprep.subr.bf16.mxu0 %v785_v38  ;;  %457 = vmatprep.subr.bf16.mxu1 %v787_v39  ;;  %v811_v32 = vcombine.high %v79_v27, %v87_v28  ;;  %v810_v34 = vcombine.low %v79_v27, %v87_v28 }
  0x39   :  { %446 = vmatprep.mubr.bf16.mxu0 %v918_v0  ;;  %487 = vmatprep.mubr.bf16.mxu1 %v918_v0 }
  0x3b   :  { %417 = vmatpush1.bf16.msra.mxu0 %v784_v44  ;;  %458 = vmatpush1.bf16.msra.mxu1 %v786_v45 }
  0x3c   :  { %418 = vmatprep.subr.bf16.mxu0 %v801_v46  ;;  %459 = vmatprep.subr.bf16.mxu1 %v803_v47 }
  0x3f   :  { %419 = vmatpush1.bf16.msra.mxu0 %v800_v52  ;;  %460 = vmatpush1.bf16.msra.mxu1 %v802_v53 }
  0x40   :  { %496 = vmatprep.subr.bf16.mxu0 %v773_v54  ;;  %537 = vmatprep.subr.bf16.mxu1 %v775_v55 }
  0x42   :  { %814 = vmatmul.mubr.msk.bf16.vlgmr.msra.gmra.mrb[4].mxu0 %vm328_vm0, %v961_v35  ;;  %815 = vmatmul.mubr.msk.bf16.vlgmr.msra.gmra.mrb[4].mxu1 %vm328_vm0, %v961_v35 }
  0x43   :  { %497 = vmatpush1.bf16.msra.mxu0 %v772_v60  ;;  %538 = vmatpush1.bf16.msra.mxu1 %v774_v61 }
  0x44   :  { %498 = vmatprep.subr.bf16.mxu0 %v789_v62  ;;  %539 = vmatprep.subr.bf16.mxu1 %v791_v63 }
  0x45   :  { %528 = vmatprep.mubr.bf16.mxu0 %v918_v0  ;;  %569 = vmatprep.mubr.bf16.mxu1 %v918_v0 }
  0x47   :  { %499 = vmatpush1.bf16.msra.mxu0 %v788_v5  ;;  %540 = vmatpush1.bf16.msra.mxu1 %v790_v6 }
  0x48   :  { %500 = vmatprep.subr.bf16.mxu0 %v805_v7  ;;  %541 = vmatprep.subr.bf16.mxu1 %v807_v8 }
  0x4b   :  { %501 = vmatpush1.bf16.msra.mxu0 %v804_v13  ;;  %542 = vmatpush1.bf16.msra.mxu1 %v806_v14 }
  0x4c   :  { %578 = vmatprep.subr.bf16.mxu0 %v777_v15  ;;  %619 = vmatprep.subr.bf16.mxu1 %v779_v16 }
  0x4e   :  { %816 = vmatmul.mubr.msk.bf16.vlgmr.msra.gmra.mrb[8].mxu0 %vm328_vm0, %v961_v35  ;;  %817 = vmatmul.mubr.msk.bf16.vlgmr.msra.gmra.mrb[8].mxu1 %vm328_vm0, %v961_v35 }
  0x4f   :  { %579 = vmatpush1.bf16.msra.mxu0 %v776_v21  ;;  %620 = vmatpush1.bf16.msra.mxu1 %v778_v22 }
  0x50   :  { %580 = vmatprep.subr.bf16.mxu0 %v793_v23  ;;  %621 = vmatprep.subr.bf16.mxu1 %v795_v24 }
  0x51   :  { %610 = vmatprep.mubr.bf16.mxu0 %v918_v0  ;;  %651 = vmatprep.mubr.bf16.mxu1 %v918_v0 }
  0x53   :  { %581 = vmatpush1.bf16.msra.mxu0 %v792_v29  ;;  %622 = vmatpush1.bf16.msra.mxu1 %v794_v30 }
  0x54   :  { %582 = vmatprep.subr.bf16.mxu0 %v809_v31  ;;  %623 = vmatprep.subr.bf16.mxu1 %v811_v32 }
  0x57   :  { %583 = vmatpush1.bf16.msra.mxu0 %v808_v33  ;;  %624 = vmatpush1.bf16.msra.mxu1 %v810_v34 }
  0x5a   :  { %818 = vmatmul.mubr.msk.bf16.vlgmr.msra.gmra.mrb[12].mxu0 %vm328_vm0, %v961_v35  ;;  %819 = vmatmul.mubr.msk.bf16.vlgmr.msra.gmra.mrb[12].mxu1 %vm328_vm0, %v961_v35 }
 0x109   :  { %v366_v36 = vpop.f32.mrb[0].mxu0  ;;  %v407_v38 = vpop.f32.mrb[0].mxu1 }
 0x10a   :  { %v660_v37 = vmax.f32 %v366_v36, 0.0  ;;  %v368_v39 = vpop.f32.mrb[1].mxu0  ;;  %v662_v40 = vmax.f32 %v407_v38, 0.0  ;;  %v409_v41 = vpop.f32.mrb[1].mxu1 }
 0x10b   :  { %v661_v0 = vmax.f32 %v368_v39, 0.0  ;;  %v370_v42 = vpop.f32.mrb[2].mxu0  ;;  %v663_v43 = vmax.f32 %v409_v41, 0.0  ;;  %v411_v44 = vpop.f32.mrb[2].mxu1 }
 0x10c   :  { %v371_v45 = vpop.f32.mrb[3].mxu0  ;;  %v412_v47 = vpop.f32.mrb[3].mxu1 }
 0x10d   :  { %v828_v46 = vpack.c.bf16 %v661_v0, %v660_v37  ;;  %v829_v48 = vpack.c.bf16 %v663_v43, %v662_v40 }
 0x10f   :  { %740 = vst [vmem:[#allocation7] sm:$0xff] %v828_v46  ;;  %741 = vst [vmem:[#allocation7 + $0x8] sm:$0xff] %v829_v48 }
 0x115   :  { %v448_v49 = vpop.f32.mrb[4].mxu0  ;;  %v489_v51 = vpop.f32.mrb[4].mxu1 }
 0x116   :  { %v664_v50 = vmax.f32 %v448_v49, 0.0  ;;  %v450_v35 = vpop.f32.mrb[5].mxu0  ;;  %v666_v52 = vmax.f32 %v489_v51, 0.0  ;;  %v491_v54 = vpop.f32.mrb[5].mxu1 }
 0x117   :  { %v665_v53 = vmax.f32 %v450_v35, 0.0  ;;  %v452_v55 = vpop.f32.mrb[6].mxu0  ;;  %v667_v56 = vmax.f32 %v491_v54, 0.0  ;;  %v493_v57 = vpop.f32.mrb[6].mxu1 }
 0x118   :  { %v453_v58 = vpop.f32.mrb[7].mxu0  ;;  %v494_v60 = vpop.f32.mrb[7].mxu1 }
 0x119   :  { %v830_v59 = vpack.c.bf16 %v665_v53, %v664_v50  ;;  %v831_v61 = vpack.c.bf16 %v667_v56, %v666_v52 }
 0x11b   :  { %742 = vst [vmem:[#allocation7 + $0x10] sm:$0xff] %v830_v59  ;;  %743 = vst [vmem:[#allocation7 + $0x18] sm:$0xff] %v831_v61 }
 0x121   :  { %v530_v62 = vpop.f32.mrb[8].mxu0  ;;  %v571_v1 = vpop.f32.mrb[8].mxu1 }
 0x122   :  { %v668_v63 = vmax.f32 %v530_v62, 0.0  ;;  %v532_v2 = vpop.f32.mrb[9].mxu0  ;;  %v670_v3 = vmax.f32 %v571_v1, 0.0  ;;  %v573_v5 = vpop.f32.mrb[9].mxu1 }
 0x123   :  { %v669_v4 = vmax.f32 %v532_v2, 0.0  ;;  %v534_v6 = vpop.f32.mrb[10].mxu0  ;;  %v671_v7 = vmax.f32 %v573_v5, 0.0  ;;  %v575_v8 = vpop.f32.mrb[10].mxu1 }
 0x124   :  { %v535_v9 = vpop.f32.mrb[11].mxu0  ;;  %v576_v11 = vpop.f32.mrb[11].mxu1 }
 0x125   :  { %v832_v10 = vpack.c.bf16 %v669_v4, %v668_v63  ;;  %v833_v12 = vpack.c.bf16 %v671_v7, %v670_v3 }
 0x127   :  { %744 = vst [vmem:[#allocation7 + $0x20] sm:$0xff] %v832_v10  ;;  %745 = vst [vmem:[#allocation7 + $0x28] sm:$0xff] %v833_v12 }
 0x12d   :  { %v612_v13 = vpop.f32.mrb[12].mxu0  ;;  %v653_v15 = vpop.f32.mrb[12].mxu1 }
 0x12e   :  { %v672_v14 = vmax.f32 %v612_v13, 0.0  ;;  %v614_v16 = vpop.f32.mrb[13].mxu0  ;;  %v674_v17 = vmax.f32 %v653_v15, 0.0  ;;  %v655_v19 = vpop.f32.mrb[13].mxu1 }
 0x12f   :  { %v673_v18 = vmax.f32 %v614_v16, 0.0  ;;  %v616_v20 = vpop.f32.mrb[14].mxu0  ;;  %v675_v21 = vmax.f32 %v655_v19, 0.0  ;;  %v657_v22 = vpop.f32.mrb[14].mxu1 }
 0x130   :  { %v617_v23 = vpop.f32.mrb[15].mxu0  ;;  %v658_v25 = vpop.f32.mrb[15].mxu1 }
 0x131   :  { %v834_v24 = vpack.c.bf16 %v673_v18, %v672_v14  ;;  %v835_v26 = vpack.c.bf16 %v675_v21, %v674_v17 }
 0x133   :  { %746 = vst [vmem:[#allocation7 + $0x30] sm:$0xff] %v834_v24  ;;  %747 = vst [vmem:[#allocation7 + $0x38] sm:$0xff] %v835_v26 }
 0x134   :  { %897 = shalt.err (!%p894_p6)
}
 0x135   :  { %s898_s10 = scalar_lea.hbm %s999_s2, 1024 }
 0x136   :  { %p899_p7 = scmp.ne.s32.totalorder %s999_s2, %s898_s10  ;;  %p902_p8 = scmp.lt.u32.totalorder %s898_s10, %s999_s2 }
 0x138   :  { %p904_p9 = pnand %p902_p8, %p899_p7 }
 0x13a   :  { %907 = shalt.err (!%p904_p9)
}
 0x13b   :  { %757 = dma.vmem_to_hbm [thread:$0]  %s755_s6, 1024, %s999_s2, [#allocation4]  }
 0x13c   :  { %912 = dma.done.wait [#allocation4], 1024  }
 0x13d   :  { %913 = vsyncadd [#allocation4], 4294966272 }
 0x13e   :  { %761 = vsyncpa [#allocation3], 1 }
 0x13f   :  { %762 = vsyncpa [#allocation6], 1 }
 0x140   :  { %763 = vsyncpa [#allocation4], 1 }

// kernel: gan_d_forward.6
= control target key start
LH: loop header
LB: loop body
LE: loop exit
PB: predicated region body
PF: predicated region fallthrough
CT: control target
= control target key end

     0   :  { %10 = vsyncpa [#allocation3], 0  ;;  %s775_s0 = inlined_call_operand.hbm [shape: bf16[128,512], index: 0, kind: input, shape index: {}]   ;;  %s776_s1 = inlined_call_operand.hbm [shape: bf16[16,128], index: 1, kind: input, shape index: {}]   ;;  %s777_s2 = inlined_call_operand.hbm [shape: bf16[16,512], index: 2, kind: output, shape index: {0}]   ;;  %s778_s3 = inlined_call_operand.hbm [shape: f32[1,16,1], index: 3, kind: output, shape index: {1}]   ;;  %s779_s4 = inlined_call_operand.hbm [shape: f32[1,16,1], index: 4, kind: output, shape index: {2}]  }
   0x1   :  { %11 = vsyncpa [#allocation6], 0 }
   0x2   :  { %12 = vsyncpa [#allocation4], 0 }
   0x3   :  { %13 = vsyncpa [#allocation9], 0  ;;  %s661_s15 = smov [#allocation2]   ;;  %s543_s19 = scalar_lea.hbm %s775_s0, 4096 }
   0x4   :  { %s19_s16 = sshll.u32 %s661_s15, 4  ;;  %p544_p0 = scmp.ne.s32.totalorder %s775_s0, %s543_s19  ;;  %s20_s16 = int_to_ptr.vmem [resolvable:$true] %s19_s16 }
   0x5   :  { %p547_p1 = scmp.lt.u32.totalorder %s543_s19, %s775_s0 }
   0x7   :  { %p549_p2 = pnand %p547_p1, %p544_p0 }
   0x9   :  { %552 = shalt.err (!%p549_p2)
}
   0xa   :  { %s553_s24 = scalar_lea.vmem %s20_s16, 4096  ;;  %p558_p4 = scmp.lt.s32.totalorder %s20_s16, %s20_s16 }
   0xb   :  { %p554_p3 = scmp.ne.s32.totalorder %s20_s16, %s553_s24  ;;  %p559_p5 = scmp.lt.s32.totalorder %s553_s24, %s553_s24 }
   0xd   :  { %p560_p6 = por %p559_p5, %p558_p4 }
   0xf   :  { %p561_p7 = pnand %p560_p6, %p554_p3 }
  0x11   :  { %564 = shalt.err (!%p561_p7)
}
  0x12   :  { %s662_s25 = smov 256   ;;  %s663_s26 = smov 16  }
  0x13   :  { %25 = dma.hbm_to_vmem [thread:$0]  %s775_s0, 4096, %s20_s16, [#allocation3], %s662_s25, %s662_s25, %s663_s26  }
  0x14   :  { %s664_s29 = smov [#allocation5]   ;;  %s565_s7 = scalar_lea.hbm %s776_s1, 128 }
  0x15   :  { %s31_s30 = sshll.u32 %s664_s29, 4  ;;  %p566_p8 = scmp.ne.s32.totalorder %s776_s1, %s565_s7  ;;  %s32_s30 = int_to_ptr.vmem [resolvable:$true] %s31_s30 }
  0x16   :  { %p569_p9 = scmp.lt.u32.totalorder %s565_s7, %s776_s1 }
  0x18   :  { %p571_p10 = pnand %p569_p9, %p566_p8 }
  0x1a   :  { %574 = shalt.err (!%p571_p10)
}
  0x1b   :  { %s575_s12 = scalar_lea.vmem %s32_s30, 128  ;;  %p580_p12 = scmp.lt.s32.totalorder %s32_s30, %s32_s30 }
  0x1c   :  { %p576_p11 = scmp.ne.s32.totalorder %s32_s30, %s575_s12  ;;  %p581_p13 = scmp.lt.s32.totalorder %s575_s12, %s575_s12 }
  0x1e   :  { %p582_p0 = por %p581_p13, %p580_p12 }
  0x20   :  { %p583_p1 = pnand %p582_p0, %p576_p11 }
  0x22   :  { %586 = shalt.err (!%p583_p1)
}
  0x23   :  { %s665_s0 = smov 64   ;;  %s666_s13 = smov 4  }
  0x24   :  { %37 = dma.hbm_to_vmem [thread:$0]  %s776_s1, 128, %s32_s30, [#allocation6], %s665_s0, %s665_s0, %s666_s13  }
  0x25   :  { %653 = dma.done.wait [#allocation3], 4096  }
  0x26   :  { %654 = vsyncadd [#allocation3], 4294963200 }
  0x27   :  { %655 = dma.done.wait [#allocation6], 128  }
  0x28   :  { %656 = vsyncadd [#allocation6], 4294967168  ;;  %v667_v0 = vmov 0   ;;  %v494_v1 = vld [vmem:[#allocation2 + $0x4] ss:$16 sps:$4 sm:$0xff]   ;;  %s668_s1 = smov [#allocation7]  }
  0x29   :  { %277 = vmatprep.mubr.bf16.mxu0 %v667_v0  ;;  %320 = vmatprep.mubr.bf16.mxu1 %v667_v0  ;;  %v496_v2 = vld [vmem:[#allocation2 + $0xc] ss:$16 sps:$4 sm:$0xff]   ;;  %v498_v3 = vld [vmem:[#allocation2] ss:$16 sps:$4 sm:$0xff]   ;;  %v499_v4 = vld [vmem:[#allocation2 + $0x8] ss:$16 sps:$4 sm:$0xff]  }
  0x2a   :  { %245 = vmatprep.subr.bf16.mxu0 %v494_v1  ;;  %288 = vmatprep.subr.bf16.mxu1 %v496_v2  ;;  %v500_v5 = vld [vmem:[#allocation2 + $0x24] ss:$16 sps:$4 sm:$0xff]   ;;  %v502_v6 = vld [vmem:[#allocation2 + $0x2c] ss:$16 sps:$4 sm:$0xff]   ;;  %v504_v7 = vld [vmem:[#allocation2 + $0x20] ss:$16 sps:$4 sm:$0xff]  }
  0x2b   :  { %246 = vmatpush1.bf16.msra.mxu0 %v498_v3  ;;  %289 = vmatpush1.bf16.msra.mxu1 %v499_v4  ;;  %v505_v8 = vld [vmem:[#allocation2 + $0x28] ss:$16 sps:$4 sm:$0xff]   ;;  %v506_v9 = vld [vmem:[#allocation2 + $0x44] ss:$16 sps:$4 sm:$0xff]   ;;  %v508_v10 = vld [vmem:[#allocation2 + $0x4c] ss:$16 sps:$4 sm:$0xff]  }
  0x2c   :  { %247 = vmatprep.subr.bf16.mxu0 %v500_v5  ;;  %290 = vmatprep.subr.bf16.mxu1 %v502_v6  ;;  %v510_v11 = vld [vmem:[#allocation2 + $0x40] ss:$16 sps:$4 sm:$0xff]   ;;  %v511_v12 = vld [vmem:[#allocation2 + $0x48] ss:$16 sps:$4 sm:$0xff]   ;;  %v512_v13 = vld [vmem:[#allocation2 + $0x64] ss:$16 sps:$4 sm:$0xff]  }
  0x2d   :  { %v514_v14 = vld [vmem:[#allocation2 + $0x6c] ss:$16 sps:$4 sm:$0xff]   ;;  %v516_v15 = vld [vmem:[#allocation2 + $0x60] ss:$16 sps:$4 sm:$0xff]   ;;  %v517_v16 = vld [vmem:[#allocation2 + $0x68] ss:$16 sps:$4 sm:$0xff]  }
  0x2e   :  { %v518_v17 = vld [vmem:[#allocation2 + $0x84] ss:$16 sps:$4 sm:$0xff]   ;;  %v520_v18 = vld [vmem:[#allocation2 + $0x8c] ss:$16 sps:$4 sm:$0xff]   ;;  %v522_v19 = vld [vmem:[#allocation2 + $0x80] ss:$16 sps:$4 sm:$0xff]  }
  0x2f   :  { %248 = vmatpush1.bf16.msra.mxu0 %v504_v7  ;;  %291 = vmatpush1.bf16.msra.mxu1 %v505_v8  ;;  %v523_v20 = vld [vmem:[#allocation2 + $0x88] ss:$16 sps:$4 sm:$0xff]   ;;  %v524_v21 = vld [vmem:[#allocation2 + $0xa4] ss:$16 sps:$4 sm:$0xff]   ;;  %v526_v22 = vld [vmem:[#allocation2 + $0xac] ss:$16 sps:$4 sm:$0xff]  }
  0x30   :  { %249 = vmatprep.subr.bf16.mxu0 %v506_v9  ;;  %292 = vmatprep.subr.bf16.mxu1 %v508_v10  ;;  %v528_v23 = vld [vmem:[#allocation2 + $0xa0] ss:$16 sps:$4 sm:$0xff]   ;;  %v529_v24 = vld [vmem:[#allocation2 + $0xa8] ss:$16 sps:$4 sm:$0xff]   ;;  %v530_v25 = vld [vmem:[#allocation2 + $0xc4] ss:$16 sps:$4 sm:$0xff]  }
  0x31   :  { %v532_v26 = vld [vmem:[#allocation2 + $0xcc] ss:$16 sps:$4 sm:$0xff]   ;;  %v534_v27 = vld [vmem:[#allocation2 + $0xc0] ss:$16 sps:$4 sm:$0xff]   ;;  %v535_v28 = vld [vmem:[#allocation2 + $0xc8] ss:$16 sps:$4 sm:$0xff]  }
  0x32   :  { %v536_v29 = vld [vmem:[#allocation2 + $0xe4] ss:$16 sps:$4 sm:$0xff]   ;;  %v538_v30 = vld [vmem:[#allocation2 + $0xec] ss:$16 sps:$4 sm:$0xff]   ;;  %v540_v31 = vld [vmem:[#allocation2 + $0xe0] ss:$16 sps:$4 sm:$0xff]  }
  0x33   :  { %250 = vmatpush1.bf16.msra.mxu0 %v510_v11  ;;  %293 = vmatpush1.bf16.msra.mxu1 %v511_v12  ;;  %v541_v32 = vld [vmem:[#allocation2 + $0xe8] ss:$16 sps:$4 sm:$0xff]   ;;  %v542_v33 = vld [vmem:[#allocation5] sm:$0xff]   ;;  %s397_s16 = sshll.u32 %s668_s1, 4  ;;  %s398_s16 = int_to_ptr.vmem [resolvable:$true] %s397_s16 }
  0x34   :  { %251 = vmatprep.subr.bf16.mxu0 %v512_v13  ;;  %294 = vmatprep.subr.bf16.mxu1 %v514_v14  ;;  %s587_s17 = scalar_lea.vmem %s398_s16, 512  ;;  %p592_p3 = scmp.lt.s32.totalorder %s398_s16, %s398_s16 }
  0x35   :  { %p588_p2 = scmp.ne.s32.totalorder %s398_s16, %s587_s17  ;;  %p593_p4 = scmp.lt.s32.totalorder %s587_s17, %s587_s17 }
  0x37   :  { %252 = vmatpush1.bf16.msra.mxu0 %v516_v15  ;;  %295 = vmatpush1.bf16.msra.mxu1 %v517_v16  ;;  %p594_p5 = por %p593_p4, %p592_p3 }
  0x38   :  { %253 = vmatprep.subr.bf16.mxu0 %v518_v17  ;;  %296 = vmatprep.subr.bf16.mxu1 %v520_v18 }
  0x39   :  { %p595_p6 = pnand %p594_p5, %p588_p2 }
  0x3b   :  { %254 = vmatpush1.bf16.msra.mxu0 %v522_v19  ;;  %297 = vmatpush1.bf16.msra.mxu1 %v523_v20 }
  0x3c   :  { %255 = vmatprep.subr.bf16.mxu0 %v524_v21  ;;  %298 = vmatprep.subr.bf16.mxu1 %v526_v22 }
  0x3f   :  { %256 = vmatpush1.bf16.msra.mxu0 %v528_v23  ;;  %299 = vmatpush1.bf16.msra.mxu1 %v529_v24 }
  0x40   :  { %257 = vmatprep.subr.bf16.mxu0 %v530_v25  ;;  %300 = vmatprep.subr.bf16.mxu1 %v532_v26 }
  0x43   :  { %258 = vmatpush1.bf16.msra.mxu0 %v534_v27  ;;  %301 = vmatpush1.bf16.msra.mxu1 %v535_v28 }
  0x44   :  { %259 = vmatprep.subr.bf16.mxu0 %v536_v29  ;;  %302 = vmatprep.subr.bf16.mxu1 %v538_v30 }
  0x47   :  { %260 = vmatpush1.bf16.msra.mxu0 %v540_v31  ;;  %303 = vmatpush1.bf16.msra.mxu1 %v541_v32 }
  0x4a   :  { %278 = vmatmul.mubr.bf16.vlgmr.msra.gmra.mrb[0].mxu0 %v542_v33  ;;  %321 = vmatmul.mubr.bf16.vlgmr.msra.gmra.mrb[0].mxu1 %v542_v33 }
 0x11d   :  { %v279_v34 = vpop.f32.mrb[0].mxu0  ;;  %v322_v35 = vpop.f32.mrb[0].mxu1 }
 0x11e   :  { %v372_v36 = vmul.f32 %v279_v34, %v279_v34  ;;  %v281_v37 = vpop.f32.mrb[1].mxu0  ;;  %v324_v38 = vpop.f32.mrb[1].mxu1  ;;  %v374_v45 = vmul.f32 %v322_v35, %v322_v35 }
 0x11f   :  { %v478_v39 = vpack.c.bf16 %v281_v37, %v279_v34  ;;  %v359_v40 = vadd.f32 %v281_v37, %v279_v34  ;;  %v373_v41 = vmul.f32 %v281_v37, %v281_v37  ;;  %v479_v42 = vpack.c.bf16 %v324_v38, %v322_v35  ;;  %v283_v43 = vpop.f32.mrb[2].mxu0  ;;  %v326_v44 = vpop.f32.mrb[2].mxu1 }
 0x120   :  { %v376_v46 = vmul.f32 %v283_v43, %v283_v43  ;;  %v285_v47 = vpop.f32.mrb[3].mxu0  ;;  %v328_v48 = vpop.f32.mrb[3].mxu1  ;;  %v378_v55 = vmul.f32 %v326_v44, %v326_v44  ;;  %v375_v59 = vmul.f32 %v324_v38, %v324_v38 }
 0x121   :  { %355 = vst [vmem:[#allocation7] sm:$0xff] %v478_v39  ;;  %356 = vst [vmem:[#allocation7 + $0x8] sm:$0xff] %v479_v42  ;;  %v480_v49 = vpack.c.bf16 %v285_v47, %v283_v43  ;;  %v364_v50 = vadd.f32 %v285_v47, %v283_v43  ;;  %v377_v51 = vmul.f32 %v285_v47, %v285_v47 }
 0x122   :  { %v481_v52 = vpack.c.bf16 %v328_v48, %v326_v44  ;;  %v360_v53 = vadd.f32 %v359_v40, %v322_v35  ;;  %v380_v54 = vadd.f32 %v373_v41, %v372_v36  ;;  %v379_v61 = vmul.f32 %v328_v48, %v328_v48 }
 0x123   :  { %357 = vst [vmem:[#allocation7 + $0x10] sm:$0xff] %v480_v49  ;;  %v385_v56 = vadd.f32 %v377_v51, %v376_v46  ;;  %v365_v57 = vadd.f32 %v364_v50, %v326_v44 }
 0x124   :  { %358 = vst [vmem:[#allocation7 + $0x18] sm:$0xff] %v481_v52  ;;  %v361_v58 = vadd.f32 %v360_v53, %v324_v38  ;;  %v381_v60 = vadd.f32 %v380_v54, %v374_v45 }
 0x125   :  { %v366_v62 = vadd.f32 %v365_v57, %v328_v48  ;;  %v386_v63 = vadd.f32 %v385_v56, %v378_v55 }
 0x126   :  { %362 = vadd.xlane.f32.xlu0 %v361_v58  ;;  %v382_v0 = vadd.f32 %v381_v60, %v375_v59 }
 0x127   :  { %v387_v1 = vadd.f32 %v386_v63, %v379_v61 }
 0x128   :  { %383 = vadd.xlane.f32.xlu1 %v382_v0 }
 0x12a   :  { %367 = vadd.xlane.f32.xlu0 %v366_v62 }
 0x12c   :  { %388 = vadd.xlane.f32.xlu1 %v387_v1 }
 0x12d   :  { %598 = shalt.err (!%p595_p6)
}
 0x12e   :  { %s599_s20 = scalar_lea.hbm %s777_s2, 512 }
 0x12f   :  { %p600_p7 = scmp.ne.s32.totalorder %s777_s2, %s599_s20  ;;  %p603_p8 = scmp.lt.u32.totalorder %s599_s20, %s777_s2 }
 0x131   :  { %p605_p9 = pnand %p603_p8, %p600_p7 }
 0x133   :  { %608 = shalt.err (!%p605_p9)
}
 0x134   :  { %403 = dma.vmem_to_hbm [thread:$0]  %s398_s16, 512, %s777_s2, [#allocation4], %s662_s25, %s662_s25, %s663_s26   ;;  %vm369_vm0 = vcmask 7168  }
 0x135   :  { %s669_s29 = smov [#allocation8]   ;;  %s670_s5 = smov [#allocation10]  }
 0x136   :  { %s409_s30 = sshll.u32 %s669_s29, 4  ;;  %s421_s6 = sshll.u32 %s670_s5, 4  ;;  %s410_s30 = int_to_ptr.vmem [resolvable:$true] %s409_s30  ;;  %s743_s6 = int_to_ptr.vmem [resolvable:$true] %s421_s6 }
 0x137   :  { %s609_s7 = scalar_lea.vmem %s410_s30, 256  ;;  %p614_p11 = scmp.lt.s32.totalorder %s410_s30, %s410_s30 }
 0x138   :  { %p610_p10 = scmp.ne.s32.totalorder %s410_s30, %s609_s7  ;;  %p615_p12 = scmp.lt.s32.totalorder %s609_s7, %s609_s7 }
 0x13a   :  { %p616_p13 = por %p615_p12, %p614_p11 }
 0x13c   :  { %p617_p0 = pnand %p616_p13, %p610_p10 }
 0x1b3   :  { %v363_v2 = vpop.xlane.xlu0 %362 }
 0x1b4   :  { %370 = vst.msk [vmem:[#allocation8] sm:$0xff] %vm369_vm0, %v363_v2 }
 0x1b5   :  { %v384_v3 = vpop.xlane.xlu1 %383 }
 0x1b6   :  { %390 = vst.msk [vmem:[#allocation10] sm:$0xff] %vm369_vm0, %v384_v3 }
 0x1b7   :  { %v368_v4 = vpop.xlane.xlu0 %367 }
 0x1b8   :  { %371 = vst.msk [vmem:[#allocation8 + $0x8] sm:$0xff] %vm369_vm0, %v368_v4 }
 0x1b9   :  { %v389_v5 = vpop.xlane.xlu1 %388 }
 0x1ba   :  { %620 = shalt.err (!%p617_p0)
}
 0x1bb   :  { %s621_s26 = scalar_lea.hbm %s778_s3, 256 }
 0x1bc   :  { %p622_p1 = scmp.ne.s32.totalorder %s778_s3, %s621_s26  ;;  %p625_p2 = scmp.lt.u32.totalorder %s621_s26, %s778_s3 }
 0x1be   :  { %p627_p3 = pnand %p625_p2, %p622_p1 }
 0x1c0   :  { %630 = shalt.err (!%p627_p3)
}
 0x1c1   :  { %s671_s12 = smov 128   ;;  %s672_s0 = smov 8   ;;  %391 = vst.msk [vmem:[#allocation10 + $0x8] sm:$0xff] %vm369_vm0, %v389_v5 }
 0x1c2   :  { %415 = dma.vmem_to_hbm [thread:$0]  %s410_s30, 256, %s778_s3, [#allocation9], %s671_s12, %s671_s12, %s672_s0  }
 0x1c3   :  { %s631_s15 = scalar_lea.vmem %s743_s6, 256  ;;  %p636_p5 = scmp.lt.s32.totalorder %s743_s6, %s743_s6 }
 0x1c4   :  { %p632_p4 = scmp.ne.s32.totalorder %s743_s6, %s631_s15  ;;  %p637_p6 = scmp.lt.s32.totalorder %s631_s15, %s631_s15 }
 0x1c6   :  { %p638_p7 = por %p637_p6, %p636_p5 }
 0x1c8   :  { %p639_p8 = pnand %p638_p7, %p632_p4 }
 0x1ca   :  { %642 = shalt.err (!%p639_p8)
}
 0x1cb   :  { %s643_s17 = scalar_lea.hbm %s779_s4, 256 }
 0x1cc   :  { %p644_p9 = scmp.ne.s32.totalorder %s779_s4, %s643_s17  ;;  %p647_p10 = scmp.lt.u32.totalorder %s643_s17, %s779_s4 }
 0x1ce   :  { %p649_p11 = pnand %p647_p10, %p644_p9 }
 0x1d0   :  { %652 = shalt.err (!%p649_p11)
}
 0x1d1   :  { %427 = dma.vmem_to_hbm [thread:$0]  %s743_s6, 256, %s779_s4, [#allocation9], %s671_s12, %s671_s12, %s672_s0  }
 0x1d2   :  { %657 = dma.done.wait [#allocation4], 512  }
 0x1d3   :  { %658 = vsyncadd [#allocation4], 4294966784 }
 0x1d4   :  { %659 = dma.done.wait [#allocation9], 512  }
 0x1d5   :  { %660 = vsyncadd [#allocation9], 4294966784 }
 0x1d6   :  { %437 = vsyncpa [#allocation3], 1 }
 0x1d7   :  { %438 = vsyncpa [#allocation6], 1 }
 0x1d8   :  { %439 = vsyncpa [#allocation4], 1 }
 0x1d9   :  { %440 = vsyncpa [#allocation9], 1 }

// kernel: gan_d_forward.7
= control target key start
LH: loop header
LB: loop body
LE: loop exit
PB: predicated region body
PF: predicated region fallthrough
CT: control target
= control target key end

     0   :  { %10 = vsyncpa [#allocation3], 0  ;;  %s693_s0 = inlined_call_operand.hbm [shape: bf16[256,128], index: 0, kind: input, shape index: {}]   ;;  %s694_s1 = inlined_call_operand.hbm [shape: bf16[32,256], index: 1, kind: input, shape index: {}]   ;;  %s695_s2 = inlined_call_operand.hbm [shape: bf16[32,128], index: 2, kind: output, shape index: {0}]   ;;  %s696_s3 = inlined_call_operand.hbm [shape: f32[1,32,1], index: 3, kind: output, shape index: {1}]   ;;  %s697_s4 = inlined_call_operand.hbm [shape: f32[1,32,1], index: 4, kind: output, shape index: {2}]  }
   0x1   :  { %11 = vsyncpa [#allocation6], 0 }
   0x2   :  { %12 = vsyncpa [#allocation4], 0 }
   0x3   :  { %13 = vsyncpa [#allocation9], 0  ;;  %s576_s15 = smov [#allocation2]   ;;  %s458_s19 = scalar_lea.hbm %s693_s0, 2048 }
   0x4   :  { %s19_s16 = sshll.u32 %s576_s15, 4  ;;  %p459_p0 = scmp.ne.s32.totalorder %s693_s0, %s458_s19  ;;  %s20_s16 = int_to_ptr.vmem [resolvable:$true] %s19_s16 }
   0x5   :  { %p462_p1 = scmp.lt.u32.totalorder %s458_s19, %s693_s0 }
   0x7   :  { %p464_p2 = pnand %p462_p1, %p459_p0 }
   0x9   :  { %467 = shalt.err (!%p464_p2)
}
   0xa   :  { %s468_s24 = scalar_lea.vmem %s20_s16, 2048  ;;  %p473_p4 = scmp.lt.s32.totalorder %s20_s16, %s20_s16 }
   0xb   :  { %p469_p3 = scmp.ne.s32.totalorder %s20_s16, %s468_s24  ;;  %p474_p5 = scmp.lt.s32.totalorder %s468_s24, %s468_s24 }
   0xd   :  { %p475_p6 = por %p474_p5, %p473_p4 }
   0xf   :  { %p476_p7 = pnand %p475_p6, %p469_p3 }
  0x11   :  { %479 = shalt.err (!%p476_p7)
}
  0x12   :  { %s577_s25 = smov 64   ;;  %s578_s26 = smov 4  }
  0x13   :  { %25 = dma.hbm_to_vmem [thread:$0]  %s693_s0, 2048, %s20_s16, [#allocation3], %s577_s25, %s577_s25, %s578_s26  }
  0x14   :  { %s579_s29 = smov [#allocation5]   ;;  %s480_s7 = scalar_lea.hbm %s694_s1, 512 }
  0x15   :  { %s31_s30 = sshll.u32 %s579_s29, 4  ;;  %p481_p8 = scmp.ne.s32.totalorder %s694_s1, %s480_s7  ;;  %s32_s30 = int_to_ptr.vmem [resolvable:$true] %s31_s30 }
  0x16   :  { %p484_p9 = scmp.lt.u32.totalorder %s480_s7, %s694_s1 }
  0x18   :  { %p486_p10 = pnand %p484_p9, %p481_p8 }
  0x1a   :  { %489 = shalt.err (!%p486_p10)
}
  0x1b   :  { %s490_s12 = scalar_lea.vmem %s32_s30, 512  ;;  %p495_p12 = scmp.lt.s32.totalorder %s32_s30, %s32_s30 }
  0x1c   :  { %p491_p11 = scmp.ne.s32.totalorder %s32_s30, %s490_s12  ;;  %p496_p13 = scmp.lt.s32.totalorder %s490_s12, %s490_s12 }
  0x1e   :  { %p497_p0 = por %p496_p13, %p495_p12 }
  0x20   :  { %p498_p1 = pnand %p497_p0, %p491_p11 }
  0x22   :  { %501 = shalt.err (!%p498_p1)
}
  0x23   :  { %s580_s0 = smov 128   ;;  %s581_s13 = smov 8  }
  0x24   :  { %37 = dma.hbm_to_vmem [thread:$0]  %s694_s1, 512, %s32_s30, [#allocation6], %s580_s0, %s580_s0, %s581_s13  }
  0x25   :  { %568 = dma.done.wait [#allocation3], 2048  }
  0x26   :  { %569 = vsyncadd [#allocation3], 4294965248 }
  0x27   :  { %570 = dma.done.wait [#allocation6], 512  }
  0x28   :  { %571 = vsyncadd [#allocation6], 4294966784  ;;  %v436_v0 = vld [vmem:[#allocation2 + $0x40] sm:$0xff]   ;;  %v438_v2 = vld [vmem:[#allocation2 + $0x48] sm:$0xff]   ;;  %s582_s1 = smov [#allocation7]  }
  0x29   :  { %v437_v1 = vld [vmem:[#allocation2] sm:$0xff]   ;;  %383 = vmatprep.subr.bf16.mxu0 %v436_v0  ;;  %411 = vmatprep.subr.bf16.mxu1 %v436_v0  ;;  %v439_v3 = vld [vmem:[#allocation2 + $0x8] sm:$0xff]   ;;  %v440_v4 = vld [vmem:[#allocation2 + $0x50] sm:$0xff]   ;;  %s300_s16 = sshll.u32 %s582_s1, 4  ;;  %s301_s16 = int_to_ptr.vmem [resolvable:$true] %s300_s16 }
  0x2a   :  { %384 = vmatpush3.bf16.msra.mxu0 %v437_v1  ;;  %419 = vmatpush3.bf16.msra.mxu1 %v437_v1  ;;  %v441_v5 = vld [vmem:[#allocation2 + $0x10] sm:$0xff]   ;;  %v442_v6 = vld [vmem:[#allocation2 + $0x58] sm:$0xff]   ;;  %v444_v8 = vld [vmem:[#allocation2 + $0x60] sm:$0xff]   ;;  %s502_s17 = scalar_lea.vmem %s301_s16, 256  ;;  %p507_p3 = scmp.lt.s32.totalorder %s301_s16, %s301_s16 }
  0x2b   :  { %385 = vmatprep.subr.bf16.mxu0 %v438_v2  ;;  %412 = vmatprep.subr.bf16.mxu1 %v438_v2  ;;  %v443_v7 = vld [vmem:[#allocation2 + $0x18] sm:$0xff]   ;;  %v445_v9 = vld [vmem:[#allocation2 + $0x20] sm:$0xff]   ;;  %v446_v10 = vld [vmem:[#allocation2 + $0x68] sm:$0xff]   ;;  %p503_p2 = scmp.ne.s32.totalorder %s301_s16, %s502_s17  ;;  %p508_p4 = scmp.lt.s32.totalorder %s502_s17, %s502_s17 }
  0x2c   :  { %v454_v11 = vld [vmem:[#allocation5 + $0x4] ss:$8 sps:$4 sm:$0xff]   ;;  %v457_v12 = vld [vmem:[#allocation5 + $0x14] ss:$8 sps:$4 sm:$0xff]   ;;  %v452_v18 = vld [vmem:[#allocation5] ss:$8 sps:$4 sm:$0xff]  }
  0x2d   :  { %v447_v13 = vld [vmem:[#allocation2 + $0x28] sm:$0xff]   ;;  %v448_v14 = vld [vmem:[#allocation2 + $0x70] sm:$0xff]   ;;  %229 = vmatprep.mubr.bf16.mxu0 %v454_v11  ;;  %237 = vmatprep.mubr.bf16.mxu1 %v457_v12  ;;  %v450_v16 = vld [vmem:[#allocation2 + $0x78] sm:$0xff]   ;;  %p509_p5 = por %p508_p4, %p507_p3 }
  0x2e   :  { %386 = vmatpush3.bf16.msra.mxu0 %v439_v3  ;;  %420 = vmatpush3.bf16.msra.mxu1 %v439_v3  ;;  %v449_v15 = vld [vmem:[#allocation2 + $0x30] sm:$0xff]   ;;  %v451_v17 = vld [vmem:[#allocation2 + $0x38] sm:$0xff]  }
  0x2f   :  { %387 = vmatprep.subr.bf16.mxu0 %v440_v4  ;;  %413 = vmatprep.subr.bf16.mxu1 %v440_v4  ;;  %v455_v19 = vld [vmem:[#allocation5 + $0x10] ss:$8 sps:$4 sm:$0xff]   ;;  %p510_p6 = pnand %p509_p5, %p503_p2 }
  0x32   :  { %388 = vmatpush3.bf16.msra.mxu0 %v441_v5  ;;  %421 = vmatpush3.bf16.msra.mxu1 %v441_v5 }
  0x33   :  { %389 = vmatprep.subr.bf16.mxu0 %v442_v6  ;;  %414 = vmatprep.subr.bf16.mxu1 %v442_v6 }
  0x36   :  { %390 = vmatpush3.bf16.msra.mxu0 %v443_v7  ;;  %422 = vmatpush3.bf16.msra.mxu1 %v443_v7 }
  0x37   :  { %391 = vmatprep.subr.bf16.mxu0 %v444_v8  ;;  %415 = vmatprep.subr.bf16.mxu1 %v444_v8 }
  0x3a   :  { %392 = vmatpush3.bf16.msra.mxu0 %v445_v9  ;;  %423 = vmatpush3.bf16.msra.mxu1 %v445_v9 }
  0x3b   :  { %393 = vmatprep.subr.bf16.mxu0 %v446_v10  ;;  %416 = vmatprep.subr.bf16.mxu1 %v446_v10 }
  0x3e   :  { %394 = vmatpush3.bf16.msra.mxu0 %v447_v13  ;;  %424 = vmatpush3.bf16.msra.mxu1 %v447_v13 }
  0x3f   :  { %395 = vmatprep.subr.bf16.mxu0 %v448_v14  ;;  %417 = vmatprep.subr.bf16.mxu1 %v448_v14 }
  0x42   :  { %396 = vmatpush3.bf16.msra.mxu0 %v449_v15  ;;  %425 = vmatpush3.bf16.msra.mxu1 %v449_v15 }
  0x43   :  { %397 = vmatprep.subr.bf16.mxu0 %v450_v16  ;;  %418 = vmatprep.subr.bf16.mxu1 %v450_v16 }
  0x46   :  { %398 = vmatpush3.bf16.msra.mxu0 %v451_v17  ;;  %426 = vmatpush3.bf16.msra.mxu1 %v451_v17 }
  0x49   :  { %230 = vmatmul.mubr.bf16.vlgmr.msra.gmra.mrb[0].mxu0 %v452_v18  ;;  %238 = vmatmul.mubr.bf16.vlgmr.msra.gmra.mrb[0].mxu1 %v455_v19 }
 0x11c   :  { %v399_v20 = vpop.f32.mrb[0].mxu0  ;;  %v405_v21 = vpop.f32.mrb[0].mxu1 }
 0x11d   :  { %v400_v22 = vpop.f32.mrb[1].mxu0  ;;  %v406_v23 = vpop.f32.mrb[1].mxu1 }
 0x11e   :  { %v401_v24 = vadd.f32 %v400_v22, %v399_v20  ;;  %v407_v25 = vadd.f32 %v406_v23, %v405_v21  ;;  %v402_v26 = vpop.f32.mrb[2].mxu0  ;;  %v408_v27 = vpop.f32.mrb[2].mxu1 }
 0x11f   :  { %v403_v28 = vpop.f32.mrb[3].mxu0  ;;  %v409_v29 = vpop.f32.mrb[3].mxu1 }
 0x120   :  { %v404_v30 = vadd.f32 %v403_v28, %v402_v26  ;;  %v410_v31 = vadd.f32 %v409_v29, %v408_v27  ;;  %270 = vadd.xlane.f32.xlu1 %v407_v25  ;;  %266 = vadd.xlane.f32.xlu0 %v401_v24  ;;  %v279_v35 = vmul.f32 %v401_v24, %v401_v24 }
 0x121   :  { %v281_v37 = vmul.f32 %v407_v25, %v407_v25 }
 0x122   :  { %v375_v32 = vpack.c.bf16 %v404_v30, %v401_v24  ;;  %v380_v33 = vpack.c.bf16 %v410_v31, %v407_v25  ;;  %v280_v34 = vmul.f32 %v404_v30, %v404_v30  ;;  %v282_v36 = vmul.f32 %v410_v31, %v410_v31 }
 0x124   :  { %376 = vst [vmem:[#allocation7] sm:$0xff] %v375_v32   ;;  %382 = vst [vmem:[#allocation7 + $0x8] sm:$0xff] %v380_v33   ;;  %272 = vadd.xlane.f32.xlu1 %v410_v31  ;;  %268 = vadd.xlane.f32.xlu0 %v404_v30 }
 0x128   :  { %285 = vadd.xlane.f32.xlu1 %v280_v34  ;;  %283 = vadd.xlane.f32.xlu0 %v279_v35 }
 0x12c   :  { %289 = vadd.xlane.f32.xlu1 %v282_v36  ;;  %287 = vadd.xlane.f32.xlu0 %v281_v37 }
 0x12d   :  { %513 = shalt.err (!%p510_p6)
}
 0x12e   :  { %s514_s20 = scalar_lea.hbm %s695_s2, 256 }
 0x12f   :  { %p515_p7 = scmp.ne.s32.totalorder %s695_s2, %s514_s20  ;;  %p518_p8 = scmp.lt.u32.totalorder %s514_s20, %s695_s2 }
 0x131   :  { %p520_p9 = pnand %p518_p8, %p515_p7 }
 0x133   :  { %523 = shalt.err (!%p520_p9)
}
 0x134   :  { %306 = dma.vmem_to_hbm [thread:$0]  %s301_s16, 256, %s695_s2, [#allocation4], %s577_s25, %s577_s25, %s578_s26   ;;  %vm274_vm0 = vcmask 7168  }
 0x135   :  { %s583_s29 = smov [#allocation8]  }
 0x136   :  { %s312_s30 = sshll.u32 %s583_s29, 4  ;;  %s313_s30 = int_to_ptr.vmem [resolvable:$true] %s312_s30 }
 0x137   :  { %s524_s5 = scalar_lea.vmem %s313_s30, 512  ;;  %p529_p11 = scmp.lt.s32.totalorder %s313_s30, %s313_s30 }
 0x138   :  { %p525_p10 = scmp.ne.s32.totalorder %s313_s30, %s524_s5  ;;  %p530_p12 = scmp.lt.s32.totalorder %s524_s5, %s524_s5 }
 0x13a   :  { %p531_p13 = por %p530_p12, %p529_p11 }
 0x13c   :  { %p532_p0 = pnand %p531_p13, %p525_p10 }
 0x1ad   :  { %v271_v38 = vpop.xlane.xlu1 %270  ;;  %v267_v39 = vpop.xlane.xlu0 %266 }
 0x1ae   :  { %277 = vst.msk [vmem:[#allocation8 + $0x10] sm:$0xff] %vm274_vm0, %v271_v38  ;;  %275 = vst.msk [vmem:[#allocation8] sm:$0xff] %vm274_vm0, %v267_v39 }
 0x1b1   :  { %v273_v40 = vpop.xlane.xlu1 %272  ;;  %v269_v41 = vpop.xlane.xlu0 %268 }
 0x1b2   :  { %278 = vst.msk [vmem:[#allocation8 + $0x18] sm:$0xff] %vm274_vm0, %v273_v40  ;;  %276 = vst.msk [vmem:[#allocation8 + $0x8] sm:$0xff] %vm274_vm0, %v269_v41 }
 0x1b3   :  { %535 = shalt.err (!%p532_p0)
}
 0x1b4   :  { %s536_s26 = scalar_lea.hbm %s696_s3, 512 }
 0x1b5   :  { %p537_p1 = scmp.ne.s32.totalorder %s696_s3, %s536_s26  ;;  %p540_p2 = scmp.lt.u32.totalorder %s536_s26, %s696_s3 }
 0x1b7   :  { %p542_p3 = pnand %p540_p2, %p537_p1 }
 0x1b9   :  { %545 = shalt.err (!%p542_p3)
}
 0x1ba   :  { %318 = dma.vmem_to_hbm [thread:$0]  %s313_s30, 512, %s696_s3, [#allocation9], %s580_s0, %s580_s0, %s581_s13   ;;  %v286_v42 = vpop.xlane.xlu1 %285  ;;  %v284_v43 = vpop.xlane.xlu0 %283 }
 0x1bb   :  { %s584_s12 = smov [#allocation10]   ;;  %292 = vst.msk [vmem:[#allocation10 + $0x8] sm:$0xff] %vm274_vm0, %v286_v42  ;;  %291 = vst.msk [vmem:[#allocation10] sm:$0xff] %vm274_vm0, %v284_v43 }
 0x1bc   :  { %s324_s14 = sshll.u32 %s584_s12, 4  ;;  %s325_s14 = int_to_ptr.vmem [resolvable:$true] %s324_s14 }
 0x1bd   :  { %s546_s15 = scalar_lea.vmem %s325_s14, 512  ;;  %p551_p5 = scmp.lt.s32.totalorder %s325_s14, %s325_s14 }
 0x1be   :  { %v290_v44 = vpop.xlane.xlu1 %289  ;;  %v288_v45 = vpop.xlane.xlu0 %287  ;;  %p547_p4 = scmp.ne.s32.totalorder %s325_s14, %s546_s15  ;;  %p552_p6 = scmp.lt.s32.totalorder %s546_s15, %s546_s15 }
 0x1bf   :  { %294 = vst.msk [vmem:[#allocation10 + $0x18] sm:$0xff] %vm274_vm0, %v290_v44  ;;  %293 = vst.msk [vmem:[#allocation10 + $0x10] sm:$0xff] %vm274_vm0, %v288_v45 }
 0x1c0   :  { %p553_p7 = por %p552_p6, %p551_p5 }
 0x1c2   :  { %p554_p8 = pnand %p553_p7, %p547_p4 }
 0x1c4   :  { %557 = shalt.err (!%p554_p8)
}
 0x1c5   :  { %s558_s16 = scalar_lea.hbm %s697_s4, 512 }
 0x1c6   :  { %p559_p9 = scmp.ne.s32.totalorder %s697_s4, %s558_s16  ;;  %p562_p10 = scmp.lt.u32.totalorder %s558_s16, %s697_s4 }
 0x1c8   :  { %p564_p11 = pnand %p562_p10, %p559_p9 }
 0x1ca   :  { %567 = shalt.err (!%p564_p11)
}
 0x1cb   :  { %330 = dma.vmem_to_hbm [thread:$0]  %s325_s14, 512, %s697_s4, [#allocation9], %s580_s0, %s580_s0, %s581_s13  }
 0x1cc   :  { %572 = dma.done.wait [#allocation4], 256  }
 0x1cd   :  { %573 = vsyncadd [#allocation4], 4294967040 }
 0x1ce   :  { %574 = dma.done.wait [#allocation9], 1024  }
 0x1cf   :  { %575 = vsyncadd [#allocation9], 4294966272 }
 0x1d0   :  { %340 = vsyncpa [#allocation3], 1 }
 0x1d1   :  { %341 = vsyncpa [#allocation6], 1 }
 0x1d2   :  { %342 = vsyncpa [#allocation4], 1 }
 0x1d3   :  { %343 = vsyncpa [#allocation9], 1 }

// kernel: gan_d_forward.8
= control target key start
LH: loop header
LB: loop body
LE: loop exit
PB: predicated region body
PF: predicated region fallthrough
CT: control target
= control target key end

     0   :  { %7 = vsyncpa [#allocation3], 0  ;;  %s883_s0 = inlined_call_operand.hbm [shape: bf16[512,32], index: 0, kind: input, shape index: {}]   ;;  %s884_s1 = inlined_call_operand.hbm [shape: bf16[64,512], index: 1, kind: input, shape index: {}]   ;;  %s885_s2 = inlined_call_operand.hbm [shape: f32[64,32], index: 2, kind: output, shape index: {}]  }
   0x1   :  { %8 = vsyncpa [#allocation6], 0 }
   0x2   :  { %9 = vsyncpa [#allocation4], 0  ;;  %s815_s9 = smov [#allocation2]   ;;  %s743_s13 = scalar_lea.hbm %s883_s0, 4096 }
   0x3   :  { %s15_s10 = sshll.u32 %s815_s9, 4  ;;  %p744_p0 = scmp.ne.s32.totalorder %s883_s0, %s743_s13  ;;  %s16_s10 = int_to_ptr.vmem [resolvable:$true] %s15_s10 }
   0x4   :  { %p747_p1 = scmp.lt.u32.totalorder %s743_s13, %s883_s0 }
   0x6   :  { %p749_p2 = pnand %p747_p1, %p744_p0 }
   0x8   :  { %752 = shalt.err (!%p749_p2)
}
   0x9   :  { %s753_s18 = scalar_lea.vmem %s16_s10, 4096  ;;  %p758_p4 = scmp.lt.s32.totalorder %s16_s10, %s16_s10 }
   0xa   :  { %p754_p3 = scmp.ne.s32.totalorder %s16_s10, %s753_s18  ;;  %p759_p5 = scmp.lt.s32.totalorder %s753_s18, %s753_s18 }
   0xc   :  { %p760_p6 = por %p759_p5, %p758_p4 }
   0xe   :  { %p761_p7 = pnand %p760_p6, %p754_p3 }
  0x10   :  { %764 = shalt.err (!%p761_p7)
}
  0x11   :  { %s816_s19 = smov 64   ;;  %s817_s20 = smov 4  }
  0x12   :  { %21 = dma.hbm_to_vmem [thread:$0]  %s883_s0, 4096, %s16_s10, [#allocation3], %s816_s19, %s816_s19, %s817_s20  }
  0x13   :  { %s818_s23 = smov [#allocation5]   ;;  %s765_s27 = scalar_lea.hbm %s884_s1, 2048 }
  0x14   :  { %s27_s24 = sshll.u32 %s818_s23, 4  ;;  %p766_p8 = scmp.ne.s32.totalorder %s884_s1, %s765_s27  ;;  %s28_s24 = int_to_ptr.vmem [resolvable:$true] %s27_s24 }
  0x15   :  { %p769_p9 = scmp.lt.u32.totalorder %s765_s27, %s884_s1 }
  0x17   :  { %p771_p10 = pnand %p769_p9, %p766_p8 }
  0x19   :  { %774 = shalt.err (!%p771_p10)
}
  0x1a   :  { %s775_s4 = scalar_lea.vmem %s28_s24, 2048  ;;  %p780_p12 = scmp.lt.s32.totalorder %s28_s24, %s28_s24 }
  0x1b   :  { %p776_p11 = scmp.ne.s32.totalorder %s28_s24, %s775_s4  ;;  %p781_p13 = scmp.lt.s32.totalorder %s775_s4, %s775_s4 }
  0x1d   :  { %p782_p0 = por %p781_p13, %p780_p12 }
  0x1f   :  { %p783_p1 = pnand %p782_p0, %p776_p11 }
  0x21   :  { %786 = shalt.err (!%p783_p1)
}
  0x22   :  { %s819_s0 = smov 256   ;;  %s820_s5 = smov 16  }
  0x23   :  { %33 = dma.hbm_to_vmem [thread:$0]  %s884_s1, 2048, %s28_s24, [#allocation6], %s819_s0, %s819_s0, %s820_s5  }
  0x24   :  { %809 = dma.done.wait [#allocation3], 4096  }
  0x25   :  { %810 = vsyncadd [#allocation3], 4294963200 }
  0x26   :  { %811 = dma.done.wait [#allocation6], 2048  }
  0x27   :  { %812 = vsyncadd [#allocation6], 4294965248  ;;  %v687_v0 = vld [vmem:[#allocation2 + $0x40] sm:$0xff]   ;;  %v691_v4 = vld [vmem:[#allocation2 + $0x48] sm:$0xff]   ;;  %vm523_vm0 = vcmask 261120   ;;  %s821_s1 = smov [#allocation7]  }
  0x28   :  { %v688_v1 = vld [vmem:[#allocation2 + $0xc0] sm:$0xff]   ;;  %598 = vmatprep.subr.bf16.mxu0 %v687_v0  ;;  %v692_v5 = vld [vmem:[#allocation2 + $0xc8] sm:$0xff]   ;;  %v695_v8 = vld [vmem:[#allocation2 + $0x50] sm:$0xff]   ;;  %s537_s8 = sshll.u32 %s821_s1, 4  ;;  %s538_s8 = int_to_ptr.vmem [resolvable:$true] %s537_s8 }
  0x29   :  { %v689_v2 = vld [vmem:[#allocation2] sm:$0xff]   ;;  %638 = vmatprep.subr.bf16.mxu1 %v688_v1  ;;  %v693_v6 = vld [vmem:[#allocation2 + $0x8] sm:$0xff]   ;;  %v696_v9 = vld [vmem:[#allocation2 + $0xd0] sm:$0xff]   ;;  %s787_s9 = scalar_lea.vmem %s538_s8, 1024  ;;  %p792_p3 = scmp.lt.s32.totalorder %s538_s8, %s538_s8 }
  0x2a   :  { %v690_v3 = vld [vmem:[#allocation2 + $0x80] sm:$0xff]   ;;  %599 = vmatpush3.bf16.msra.mxu0 %v689_v2  ;;  %v694_v7 = vld [vmem:[#allocation2 + $0x88] sm:$0xff]   ;;  %v697_v10 = vld [vmem:[#allocation2 + $0x10] sm:$0xff]   ;;  %p788_p2 = scmp.ne.s32.totalorder %s538_s8, %s787_s9  ;;  %p793_p4 = scmp.lt.s32.totalorder %s787_s9, %s787_s9 }
  0x2b   :  { %639 = vmatpush3.bf16.msra.mxu1 %v690_v3  ;;  %600 = vmatprep.subr.bf16.mxu0 %v691_v4  ;;  %v698_v11 = vld [vmem:[#allocation2 + $0x90] sm:$0xff]   ;;  %v699_v12 = vld [vmem:[#allocation2 + $0x58] sm:$0xff]   ;;  %v703_v16 = vld [vmem:[#allocation2 + $0x60] sm:$0xff]  }
  0x2c   :  { %640 = vmatprep.subr.bf16.mxu1 %v692_v5  ;;  %v700_v13 = vld [vmem:[#allocation2 + $0xd8] sm:$0xff]   ;;  %v704_v17 = vld [vmem:[#allocation2 + $0xe0] sm:$0xff]   ;;  %v707_v20 = vld [vmem:[#allocation2 + $0x68] sm:$0xff]   ;;  %p794_p5 = por %p793_p4, %p792_p3 }
  0x2d   :  { %v701_v14 = vld [vmem:[#allocation2 + $0x18] sm:$0xff]   ;;  %v705_v18 = vld [vmem:[#allocation2 + $0x20] sm:$0xff]   ;;  %v708_v21 = vld [vmem:[#allocation2 + $0xe8] sm:$0xff]  }
  0x2e   :  { %601 = vmatpush3.bf16.msra.mxu0 %v693_v6  ;;  %v702_v15 = vld [vmem:[#allocation2 + $0x98] sm:$0xff]   ;;  %v706_v19 = vld [vmem:[#allocation2 + $0xa0] sm:$0xff]   ;;  %v709_v22 = vld [vmem:[#allocation2 + $0x28] sm:$0xff]   ;;  %p795_p6 = pnand %p794_p5, %p788_p2 }
  0x2f   :  { %641 = vmatpush3.bf16.msra.mxu1 %v694_v7  ;;  %602 = vmatprep.subr.bf16.mxu0 %v695_v8  ;;  %v710_v23 = vld [vmem:[#allocation2 + $0xa8] sm:$0xff]   ;;  %v711_v24 = vld [vmem:[#allocation2 + $0x70] sm:$0xff]   ;;  %v715_v28 = vld [vmem:[#allocation2 + $0x78] sm:$0xff]  }
  0x30   :  { %642 = vmatprep.subr.bf16.mxu1 %v696_v9  ;;  %v712_v25 = vld [vmem:[#allocation2 + $0xf0] sm:$0xff]   ;;  %v716_v29 = vld [vmem:[#allocation2 + $0xf8] sm:$0xff]  }
  0x31   :  { %v713_v26 = vld [vmem:[#allocation2 + $0x30] sm:$0xff]   ;;  %v717_v30 = vld [vmem:[#allocation2 + $0x38] sm:$0xff]  }
  0x32   :  { %603 = vmatpush3.bf16.msra.mxu0 %v697_v10  ;;  %v714_v27 = vld [vmem:[#allocation2 + $0xb0] sm:$0xff]   ;;  %v718_v31 = vld [vmem:[#allocation2 + $0xb8] sm:$0xff]  }
  0x33   :  { %643 = vmatpush3.bf16.msra.mxu1 %v698_v11  ;;  %604 = vmatprep.subr.bf16.mxu0 %v699_v12  ;;  %v719_v32 = vld [vmem:[#allocation5] ss:$16 sps:$4 sm:$0xff]   ;;  %v721_v33 = vld [vmem:[#allocation5 + $0x4] ss:$16 sps:$4 sm:$0xff]   ;;  %v722_v34 = vld [vmem:[#allocation5 + $0x8] ss:$16 sps:$4 sm:$0xff]  }
  0x34   :  { %644 = vmatprep.subr.bf16.mxu1 %v700_v13  ;;  %v724_v35 = vld [vmem:[#allocation5 + $0xc] ss:$16 sps:$4 sm:$0xff]   ;;  %425 = vmatprep.mubr.bf16.mxu0 %v721_v33  ;;  %v725_v36 = vld [vmem:[#allocation5 + $0x24] ss:$16 sps:$4 sm:$0xff]   ;;  %v729_v38 = vld [vmem:[#allocation5 + $0x20] ss:$16 sps:$4 sm:$0xff]  }
  0x35   :  { %490 = vmatprep.mubr.bf16.mxu1 %v724_v35  ;;  %v727_v37 = vld [vmem:[#allocation5 + $0x2c] ss:$16 sps:$4 sm:$0xff]   ;;  %v730_v39 = vld [vmem:[#allocation5 + $0x28] ss:$16 sps:$4 sm:$0xff]   ;;  %v731_v40 = vld [vmem:[#allocation5 + $0x44] ss:$16 sps:$4 sm:$0xff]  }
  0x36   :  { %605 = vmatpush3.bf16.msra.mxu0 %v701_v14  ;;  %v733_v41 = vld [vmem:[#allocation5 + $0x4c] ss:$16 sps:$4 sm:$0xff]   ;;  %v735_v42 = vld [vmem:[#allocation5 + $0x40] ss:$16 sps:$4 sm:$0xff]   ;;  %v736_v43 = vld [vmem:[#allocation5 + $0x48] ss:$16 sps:$4 sm:$0xff]  }
  0x37   :  { %645 = vmatpush3.bf16.msra.mxu1 %v702_v15  ;;  %606 = vmatprep.subr.bf16.mxu0 %v703_v16  ;;  %v737_v44 = vld [vmem:[#allocation5 + $0x64] ss:$16 sps:$4 sm:$0xff]   ;;  %v739_v45 = vld [vmem:[#allocation5 + $0x6c] ss:$16 sps:$4 sm:$0xff]   ;;  %v741_v46 = vld [vmem:[#allocation5 + $0x60] ss:$16 sps:$4 sm:$0xff]  }
  0x38   :  { %646 = vmatprep.subr.bf16.mxu1 %v704_v17  ;;  %v742_v47 = vld [vmem:[#allocation5 + $0x68] ss:$16 sps:$4 sm:$0xff]  }
  0x3a   :  { %607 = vmatpush3.bf16.msra.mxu0 %v705_v18 }
  0x3b   :  { %647 = vmatpush3.bf16.msra.mxu1 %v706_v19  ;;  %608 = vmatprep.subr.bf16.mxu0 %v707_v20 }
  0x3c   :  { %648 = vmatprep.subr.bf16.mxu1 %v708_v21 }
  0x3e   :  { %609 = vmatpush3.bf16.msra.mxu0 %v709_v22 }
  0x3f   :  { %649 = vmatpush3.bf16.msra.mxu1 %v710_v23  ;;  %610 = vmatprep.subr.bf16.mxu0 %v711_v24 }
  0x40   :  { %650 = vmatprep.subr.bf16.mxu1 %v712_v25 }
  0x42   :  { %611 = vmatpush3.bf16.msra.mxu0 %v713_v26 }
  0x43   :  { %651 = vmatpush3.bf16.msra.mxu1 %v714_v27  ;;  %612 = vmatprep.subr.bf16.mxu0 %v715_v28 }
  0x44   :  { %652 = vmatprep.subr.bf16.mxu1 %v716_v29 }
  0x46   :  { %613 = vmatpush3.bf16.msra.mxu0 %v717_v30 }
  0x47   :  { %653 = vmatpush3.bf16.msra.mxu1 %v718_v31 }
  0x49   :  { %426 = vmatmul.mubr.bf16.vlgmr.msra.gmra.mrb[0].mxu0 %v719_v32 }
  0x4a   :  { %491 = vmatmul.mubr.bf16.vlgmr.msra.gmra.mrb[0].mxu1 %v722_v34  ;;  %433 = vmatprep.mubr.bf16.mxu0 %v725_v36 }
  0x4b   :  { %498 = vmatprep.mubr.bf16.mxu1 %v727_v37 }
  0x51   :  { %434 = vmatmul.mubr.bf16.gmra.mrb[4].mxu0 %v729_v38 }
  0x52   :  { %499 = vmatmul.mubr.bf16.gmra.mrb[4].mxu1 %v730_v39  ;;  %441 = vmatprep.mubr.bf16.mxu0 %v731_v40 }
  0x53   :  { %506 = vmatprep.mubr.bf16.mxu1 %v733_v41 }
  0x59   :  { %442 = vmatmul.mubr.bf16.gmra.mrb[8].mxu0 %v735_v42 }
  0x5a   :  { %507 = vmatmul.mubr.bf16.gmra.mrb[8].mxu1 %v736_v43  ;;  %449 = vmatprep.mubr.bf16.mxu0 %v737_v44 }
  0x5b   :  { %514 = vmatprep.mubr.bf16.mxu1 %v739_v45 }
  0x61   :  { %450 = vmatmul.mubr.bf16.gmra.mrb[12].mxu0 %v741_v46 }
  0x62   :  { %515 = vmatmul.mubr.bf16.gmra.mrb[12].mxu1 %v742_v47 }
 0x11c   :  { %v614_v48 = vpop.f32.mrb[0].mxu0 }
 0x11d   :  { %v654_v49 = vpop.f32.mrb[0].mxu1  ;;  %v615_v50 = vpop.f32.mrb[1].mxu0 }
 0x11e   :  { %v616_v51 = vadd.f32 %v615_v50, %v614_v48  ;;  %v655_v52 = vpop.f32.mrb[1].mxu1  ;;  %v617_v53 = vpop.f32.mrb[2].mxu0 }
 0x11f   :  { %v656_v54 = vadd.f32 %v655_v52, %v654_v49  ;;  %v657_v55 = vpop.f32.mrb[2].mxu1  ;;  %v618_v56 = vpop.f32.mrb[3].mxu0 }
 0x120   :  { %v619_v57 = vadd.f32 %v618_v56, %v617_v53  ;;  %v658_v58 = vpop.f32.mrb[3].mxu1 }
 0x121   :  { %v493_v59 = vadd.f32 %v656_v54, %v616_v51  ;;  %v659_v60 = vadd.f32 %v658_v58, %v657_v55 }
 0x123   :  { %524 = vst.msk [vmem:[#allocation7] sm:$0xff] %vm523_vm0, %v493_v59  ;;  %v496_v61 = vadd.f32 %v659_v60, %v619_v57 }
 0x124   :  { %v620_v62 = vpop.f32.mrb[4].mxu0 }
 0x125   :  { %525 = vst.msk [vmem:[#allocation7 + $0x8] sm:$0xff] %vm523_vm0, %v496_v61  ;;  %v660_v63 = vpop.f32.mrb[4].mxu1  ;;  %v621_v0 = vpop.f32.mrb[5].mxu0 }
 0x126   :  { %v622_v1 = vadd.f32 %v621_v0, %v620_v62  ;;  %v661_v2 = vpop.f32.mrb[5].mxu1  ;;  %v623_v3 = vpop.f32.mrb[6].mxu0 }
 0x127   :  { %v662_v4 = vadd.f32 %v661_v2, %v660_v63  ;;  %v663_v5 = vpop.f32.mrb[6].mxu1  ;;  %v624_v6 = vpop.f32.mrb[7].mxu0 }
 0x128   :  { %v625_v7 = vadd.f32 %v624_v6, %v623_v3  ;;  %v664_v8 = vpop.f32.mrb[7].mxu1 }
 0x129   :  { %v501_v9 = vadd.f32 %v662_v4, %v622_v1  ;;  %v665_v10 = vadd.f32 %v664_v8, %v663_v5 }
 0x12b   :  { %526 = vst.msk [vmem:[#allocation7 + $0x10] sm:$0xff] %vm523_vm0, %v501_v9  ;;  %v504_v11 = vadd.f32 %v665_v10, %v625_v7 }
 0x12c   :  { %v626_v12 = vpop.f32.mrb[8].mxu0 }
 0x12d   :  { %527 = vst.msk [vmem:[#allocation7 + $0x18] sm:$0xff] %vm523_vm0, %v504_v11  ;;  %v666_v13 = vpop.f32.mrb[8].mxu1  ;;  %v627_v14 = vpop.f32.mrb[9].mxu0 }
 0x12e   :  { %v628_v15 = vadd.f32 %v627_v14, %v626_v12  ;;  %v667_v16 = vpop.f32.mrb[9].mxu1  ;;  %v629_v17 = vpop.f32.mrb[10].mxu0 }
 0x12f   :  { %v668_v18 = vadd.f32 %v667_v16, %v666_v13  ;;  %v669_v19 = vpop.f32.mrb[10].mxu1  ;;  %v630_v20 = vpop.f32.mrb[11].mxu0 }
 0x130   :  { %v631_v21 = vadd.f32 %v630_v20, %v629_v17  ;;  %v670_v22 = vpop.f32.mrb[11].mxu1 }
 0x131   :  { %v509_v23 = vadd.f32 %v668_v18, %v628_v15  ;;  %v671_v24 = vadd.f32 %v670_v22, %v669_v19 }
 0x133   :  { %528 = vst.msk [vmem:[#allocation7 + $0x20] sm:$0xff] %vm523_vm0, %v509_v23  ;;  %v512_v25 = vadd.f32 %v671_v24, %v631_v21 }
 0x134   :  { %v632_v26 = vpop.f32.mrb[12].mxu0 }
 0x135   :  { %529 = vst.msk [vmem:[#allocation7 + $0x28] sm:$0xff] %vm523_vm0, %v512_v25  ;;  %v672_v27 = vpop.f32.mrb[12].mxu1  ;;  %v633_v28 = vpop.f32.mrb[13].mxu0 }
 0x136   :  { %v634_v29 = vadd.f32 %v633_v28, %v632_v26  ;;  %v673_v30 = vpop.f32.mrb[13].mxu1  ;;  %v635_v31 = vpop.f32.mrb[14].mxu0 }
 0x137   :  { %v674_v32 = vadd.f32 %v673_v30, %v672_v27  ;;  %v675_v33 = vpop.f32.mrb[14].mxu1  ;;  %v636_v34 = vpop.f32.mrb[15].mxu0 }
 0x138   :  { %v637_v35 = vadd.f32 %v636_v34, %v635_v31  ;;  %v676_v36 = vpop.f32.mrb[15].mxu1 }
 0x139   :  { %v517_v37 = vadd.f32 %v674_v32, %v634_v29  ;;  %v677_v38 = vadd.f32 %v676_v36, %v675_v33 }
 0x13b   :  { %530 = vst.msk [vmem:[#allocation7 + $0x30] sm:$0xff] %vm523_vm0, %v517_v37  ;;  %v520_v39 = vadd.f32 %v677_v38, %v637_v35 }
 0x13d   :  { %531 = vst.msk [vmem:[#allocation7 + $0x38] sm:$0xff] %vm523_vm0, %v520_v39 }
 0x13e   :  { %798 = shalt.err (!%p795_p6)
}
 0x13f   :  { %s799_s12 = scalar_lea.hbm %s885_s2, 1024 }
 0x140   :  { %p800_p7 = scmp.ne.s32.totalorder %s885_s2, %s799_s12  ;;  %p803_p8 = scmp.lt.u32.totalorder %s799_s12, %s885_s2 }
 0x142   :  { %p805_p9 = pnand %p803_p8, %p800_p7 }
 0x144   :  { %808 = shalt.err (!%p805_p9)
}
 0x145   :  { %s822_s17 = smov 128   ;;  %s823_s18 = smov 8  }
 0x146   :  { %543 = dma.vmem_to_hbm [thread:$0]  %s538_s8, 1024, %s885_s2, [#allocation4], %s822_s17, %s822_s17, %s823_s18  }
 0x147   :  { %813 = dma.done.wait [#allocation4], 1024  }
 0x148   :  { %814 = vsyncadd [#allocation4], 4294966272 }
 0x149   :  { %547 = vsyncpa [#allocation3], 1 }
 0x14a   :  { %548 = vsyncpa [#allocation6], 1 }
 0x14b   :  { %549 = vsyncpa [#allocation4], 1 }

// kernel: gan_d_forward.9
= control target key start
LH: loop header
LB: loop body
LE: loop exit
PB: predicated region body
PF: predicated region fallthrough
CT: control target
= control target key end

     0   :  { %9 = vsyncpa [#allocation3], 0  ;;  %s690_s0 = inlined_call_operand.hbm [shape: f32[64,32], index: 0, kind: input, shape index: {}]   ;;  %s691_s1 = inlined_call_operand.hbm [shape: f32[64,1], index: 1, kind: input, shape index: {}]   ;;  %s692_s2 = inlined_call_operand.hbm [shape: f32[64,1], index: 2, kind: input, shape index: {}]   ;;  %s693_s3 = inlined_call_operand.hbm [shape: f32[64,32], index: 3, kind: input, shape index: {}]   ;;  %s694_s4 = inlined_call_operand.hbm [shape: f32[1,32], index: 4, kind: output, shape index: {}]  }
   0x1   :  { %10 = vsyncpa [#allocation6], 0 }
   0x2   :  { %11 = vsyncpa [#allocation9], 0 }
   0x3   :  { %12 = vsyncpa [#allocation4], 0  ;;  %s507_s15 = smov [#allocation5]   ;;  %s508_s17 = smov [#allocation2]  }
   0x4   :  { %s30_s16 = sshll.u32 %s507_s15, 4  ;;  %s18_s18 = sshll.u32 %s508_s17, 4  ;;  %s31_s16 = int_to_ptr.vmem [resolvable:$true] %s30_s16  ;;  %s540_s18 = int_to_ptr.vmem [resolvable:$true] %s18_s18 }
   0x5   :  { %s389_s21 = scalar_lea.hbm %s691_s1, 1024 }
   0x6   :  { %p390_p0 = scmp.ne.s32.totalorder %s691_s1, %s389_s21  ;;  %p393_p1 = scmp.lt.u32.totalorder %s389_s21, %s691_s1 }
   0x8   :  { %p395_p2 = pnand %p393_p1, %p390_p0 }
   0xa   :  { %398 = shalt.err (!%p395_p2)
}
   0xb   :  { %s399_s26 = scalar_lea.vmem %s31_s16, 1024  ;;  %p404_p4 = scmp.lt.s32.totalorder %s31_s16, %s31_s16 }
   0xc   :  { %p400_p3 = scmp.ne.s32.totalorder %s31_s16, %s399_s26  ;;  %p405_p5 = scmp.lt.s32.totalorder %s399_s26, %s399_s26 }
   0xe   :  { %p406_p6 = por %p405_p5, %p404_p4 }
  0x10   :  { %p407_p7 = pnand %p406_p6, %p400_p3 }
  0x12   :  { %410 = shalt.err (!%p407_p7)
}
  0x13   :  { %s509_s27 = smov 128   ;;  %s510_s28 = smov 8  }
  0x14   :  { %36 = dma.hbm_to_vmem [thread:$0]  %s691_s1, 1024, %s31_s16, [#allocation6], %s509_s27, %s509_s27, %s510_s28  }
  0x15   :  { %s411_s7 = scalar_lea.hbm %s690_s0, 1024 }
  0x16   :  { %p412_p8 = scmp.ne.s32.totalorder %s690_s0, %s411_s7  ;;  %p415_p9 = scmp.lt.u32.totalorder %s411_s7, %s690_s0 }
  0x18   :  { %p417_p10 = pnand %p415_p9, %p412_p8 }
  0x1a   :  { %420 = shalt.err (!%p417_p10)
}
  0x1b   :  { %s421_s12 = scalar_lea.vmem %s540_s18, 1024  ;;  %p426_p12 = scmp.lt.s32.totalorder %s540_s18, %s540_s18 }
  0x1c   :  { %p422_p11 = scmp.ne.s32.totalorder %s540_s18, %s421_s12  ;;  %p427_p13 = scmp.lt.s32.totalorder %s421_s12, %s421_s12 }
  0x1e   :  { %p428_p0 = por %p427_p13, %p426_p12 }
  0x20   :  { %p429_p1 = pnand %p428_p0, %p422_p11 }
  0x22   :  { %432 = shalt.err (!%p429_p1)
}
  0x23   :  { %24 = dma.hbm_to_vmem [thread:$0]  %s690_s0, 1024, %s540_s18, [#allocation3], %s509_s27, %s509_s27, %s510_s28  }
  0x24   :  { %s511_s14 = smov [#allocation7]   ;;  %s512_s16 = smov [#allocation8]  }
  0x25   :  { %s42_s15 = sshll.u32 %s511_s14, 4  ;;  %s54_s17 = sshll.u32 %s512_s16, 4  ;;  %s43_s15 = int_to_ptr.vmem [resolvable:$true] %s42_s15  ;;  %s577_s17 = int_to_ptr.vmem [resolvable:$true] %s54_s17 }
  0x26   :  { %s433_s21 = scalar_lea.hbm %s692_s2, 1024 }
  0x27   :  { %p434_p2 = scmp.ne.s32.totalorder %s692_s2, %s433_s21  ;;  %p437_p3 = scmp.lt.u32.totalorder %s433_s21, %s692_s2 }
  0x29   :  { %p439_p4 = pnand %p437_p3, %p434_p2 }
  0x2b   :  { %442 = shalt.err (!%p439_p4)
}
  0x2c   :  { %s443_s0 = scalar_lea.vmem %s43_s15, 1024  ;;  %p448_p6 = scmp.lt.s32.totalorder %s43_s15, %s43_s15 }
  0x2d   :  { %p444_p5 = scmp.ne.s32.totalorder %s43_s15, %s443_s0  ;;  %p449_p7 = scmp.lt.s32.totalorder %s443_s0, %s443_s0 }
  0x2f   :  { %p450_p8 = por %p449_p7, %p448_p6 }
  0x31   :  { %p451_p9 = pnand %p450_p8, %p444_p5 }
  0x33   :  { %454 = shalt.err (!%p451_p9)
}
  0x34   :  { %48 = dma.hbm_to_vmem [thread:$0]  %s692_s2, 1024, %s43_s15, [#allocation6], %s509_s27, %s509_s27, %s510_s28  }
  0x35   :  { %s455_s5 = scalar_lea.hbm %s693_s3, 1024 }
  0x36   :  { %p456_p10 = scmp.ne.s32.totalorder %s693_s3, %s455_s5  ;;  %p459_p11 = scmp.lt.u32.totalorder %s455_s5, %s693_s3 }
  0x38   :  { %p461_p12 = pnand %p459_p11, %p456_p10 }
  0x3a   :  { %464 = shalt.err (!%p461_p12)
}
  0x3b   :  { %s465_s10 = scalar_lea.vmem %s577_s17, 1024  ;;  %p470_p0 = scmp.lt.s32.totalorder %s577_s17, %s577_s17 }
  0x3c   :  { %p466_p13 = scmp.ne.s32.totalorder %s577_s17, %s465_s10  ;;  %p471_p1 = scmp.lt.s32.totalorder %s465_s10, %s465_s10 }
  0x3e   :  { %p472_p2 = por %p471_p1, %p470_p0 }
  0x40   :  { %p473_p3 = pnand %p472_p2, %p466_p13 }
  0x42   :  { %476 = shalt.err (!%p473_p3)
}
  0x43   :  { %60 = dma.hbm_to_vmem [thread:$0]  %s693_s3, 1024, %s577_s17, [#allocation9], %s509_s27, %s509_s27, %s510_s28  }
  0x44   :  { %499 = dma.done.wait [#allocation3], 1024  }
  0x45   :  { %500 = vsyncadd [#allocation3], 4294966272 }
  0x46   :  { %501 = dma.done.wait [#allocation6], 2048  }
  0x47   :  { %502 = vsyncadd [#allocation6], 4294965248 }
  0x48   :  { %503 = dma.done.wait [#allocation9], 1024  }
  0x49   :  { %504 = vsyncadd [#allocation9], 4294966272  ;;  %vm81_vm0 = vcmask 261120   ;;  %v73_v0 = vld [vmem:[#allocation2] sm:$0xff]  ;;  %v75_v1 = vld [vmem:[#allocation2 + $0x10] sm:$0xff]  ;;  %v513_v16 = vmov 0  }
  0x4a   :  { %v74_v2 = vld [vmem:[#allocation2 + $0x8] sm:$0xff]  ;;  %v82_v3 = vsel %vm81_vm0, %v73_v0, 0.0  ;;  %v88_v4 = vsel %vm81_vm0, %v75_v1, 0.0  ;;  %v76_v5 = vld [vmem:[#allocation2 + $0x18] sm:$0xff]  ;;  %v77_v9 = vld [vmem:[#allocation2 + $0x20] sm:$0xff]  ;;  %371 = vset.pattern.permute.xlu1 %v513_v16  ;;  %372 = vset.pattern.permute.xlu0 %v513_v16  ;;  %s514_s3 = smov [#allocation10]  }
  0x4b   :  { %83 = vadd.xlane.f32.xlu0 %v82_v3  ;;  %89 = vadd.xlane.f32.xlu1 %v88_v4  ;;  %v85_v6 = vsel %vm81_vm0, %v74_v2, 0.0  ;;  %v91_v7 = vsel %vm81_vm0, %v76_v5, 0.0  ;;  %v78_v8 = vld [vmem:[#allocation2 + $0x28] sm:$0xff]  ;;  %v94_v11 = vsel %vm81_vm0, %v77_v9, 0.0  ;;  %v79_v12 = vld [vmem:[#allocation2 + $0x30] sm:$0xff]  ;;  %v80_v13 = vld [vmem:[#allocation2 + $0x38] sm:$0xff] }
  0x4c   :  { %v97_v10 = vsel %vm81_vm0, %v78_v8, 0.0  ;;  %v100_v14 = vsel %vm81_vm0, %v79_v12, 0.0  ;;  %v103_v15 = vsel %vm81_vm0, %v80_v13, 0.0  ;;  %v243_v57 = vld [vmem:[#allocation7] sm:$0xff]  ;;  %v244_v58 = vld [vmem:[#allocation7 + $0x8] sm:$0xff]  ;;  %v245_v59 = vld [vmem:[#allocation7 + $0x10] sm:$0xff] }
  0x4d   :  { %v246_v60 = vld [vmem:[#allocation7 + $0x18] sm:$0xff]  ;;  %v247_v61 = vld [vmem:[#allocation7 + $0x20] sm:$0xff]  ;;  %s352_s27 = sshll.u32 %s514_s3, 4  ;;  %vm344_vm1 = vcmask 253952   ;;  %s353_s27 = int_to_ptr.vmem [resolvable:$true] %s352_s27 }
  0x4e   :  { %v163_v16 = vld [vmem:[#allocation5] sm:$0xff]  ;;  %s477_s28 = scalar_lea.vmem %s353_s27, 16  ;;  %s481_s12 = scalar_lea.vmem %s353_s27, 32 }
  0x4f   :  { %86 = vadd.xlane.f32.xlu0 %v85_v6  ;;  %92 = vadd.xlane.f32.xlu1 %v91_v7  ;;  %p478_p4 = scmp.ne.s32.totalorder %s353_s27, %s477_s28  ;;  %p482_p5 = scmp.lt.s32.totalorder %s353_s27, %s353_s27 }
  0x50   :  { %p483_p6 = scmp.lt.s32.totalorder %s481_s12, %s477_s28 }
  0x52   :  { %p484_p7 = por %p483_p6, %p482_p5 }
  0x53   :  { %98 = vadd.xlane.f32.xlu1 %v97_v10  ;;  %95 = vadd.xlane.f32.xlu0 %v94_v11 }
  0x54   :  { %p485_p8 = pnand %p484_p7, %p478_p4 }
  0x57   :  { %101 = vadd.xlane.f32.xlu0 %v100_v14  ;;  %104 = vadd.xlane.f32.xlu1 %v103_v15 }
  0xd8   :  { %v84_v17 = vpop.xlane.xlu0 %83  ;;  %v90_v18 = vpop.xlane.xlu1 %89 }
  0xd9   :  { %v107_v19 = vmul.f32 0.03125, %v84_v17  ;;  %v109_v20 = vmul.f32 0.03125, %v90_v18 }
  0xdb   :  { %v622_v21 = vsub.f32 %v73_v0, %v107_v19  ;;  %v624_v22 = vsub.f32 %v75_v1, %v109_v20 }
  0xdc   :  { %v87_v23 = vpop.xlane.xlu0 %86  ;;  %v93_v24 = vpop.xlane.xlu1 %92 }
  0xdd   :  { %v108_v25 = vmul.f32 0.03125, %v87_v23  ;;  %v110_v26 = vmul.f32 0.03125, %v93_v24  ;;  %v123_v27 = vmul.f32 %v622_v21, %v622_v21  ;;  %v125_v28 = vmul.f32 %v624_v22, %v624_v22 }
  0xdf   :  { %v630_v29 = vsub.f32 %v74_v2, %v108_v25  ;;  %v632_v30 = vsub.f32 %v76_v5, %v110_v26  ;;  %v131_v31 = vsel %vm81_vm0, %v123_v27, 0.0  ;;  %v137_v34 = vsel %vm81_vm0, %v125_v28, 0.0  ;;  %v164_v26 = vld [vmem:[#allocation5 + $0x8] sm:$0xff] }
  0xe0   :  { %132 = vadd.xlane.f32.xlu0 %v131_v31  ;;  %v99_v32 = vpop.xlane.xlu1 %98  ;;  %v96_v33 = vpop.xlane.xlu0 %95 }
  0xe1   :  { %v112_v35 = vmul.f32 0.03125, %v99_v32  ;;  %v124_v36 = vmul.f32 %v630_v29, %v630_v29  ;;  %v111_v37 = vmul.f32 0.03125, %v96_v33  ;;  %v126_v38 = vmul.f32 %v632_v30, %v632_v30  ;;  %v165_v33 = vld [vmem:[#allocation5 + $0x10] sm:$0xff] }
  0xe3   :  { %v640_v39 = vsub.f32 %v78_v8, %v112_v35  ;;  %v134_v40 = vsel %vm81_vm0, %v124_v36, 0.0  ;;  %v643_v41 = vsub.f32 %v77_v9, %v111_v37  ;;  %v140_v42 = vsel %vm81_vm0, %v126_v38, 0.0  ;;  %v168_v36 = vld [vmem:[#allocation5 + $0x28] sm:$0xff]  ;;  %v166_v37 = vld [vmem:[#allocation5 + $0x18] sm:$0xff] }
  0xe4   :  { %135 = vadd.xlane.f32.xlu1 %v134_v40  ;;  %138 = vadd.xlane.f32.xlu0 %v137_v34  ;;  %v102_v43 = vpop.xlane.xlu0 %101  ;;  %v105_v44 = vpop.xlane.xlu1 %104  ;;  %v169_v40 = vld [vmem:[#allocation5 + $0x30] sm:$0xff] }
  0xe5   :  { %v113_v45 = vmul.f32 0.03125, %v102_v43  ;;  %v114_v46 = vmul.f32 0.03125, %v105_v44  ;;  %v128_v47 = vmul.f32 %v640_v39, %v640_v39  ;;  %v127_v48 = vmul.f32 %v643_v41, %v643_v41 }
  0xe7   :  { %v650_v49 = vsub.f32 %v79_v12, %v113_v45  ;;  %v652_v50 = vsub.f32 %v80_v13, %v114_v46  ;;  %v143_v51 = vsel %vm81_vm0, %v127_v48, 0.0  ;;  %v146_v52 = vsel %vm81_vm0, %v128_v47, 0.0  ;;  %v167_v46 = vld [vmem:[#allocation5 + $0x20] sm:$0xff] }
  0xe8   :  { %141 = vadd.xlane.f32.xlu1 %v140_v42  ;;  %144 = vadd.xlane.f32.xlu0 %v143_v51  ;;  %v170_v51 = vld [vmem:[#allocation5 + $0x38] sm:$0xff] }
  0xe9   :  { %v129_v53 = vmul.f32 %v650_v49, %v650_v49  ;;  %v130_v54 = vmul.f32 %v652_v50, %v652_v50 }
  0xeb   :  { %v149_v55 = vsel %vm81_vm0, %v129_v53, 0.0  ;;  %v152_v56 = vsel %vm81_vm0, %v130_v54, 0.0  ;;  %v248_v54 = vld [vmem:[#allocation7 + $0x28] sm:$0xff] }
  0xec   :  { %147 = vadd.xlane.f32.xlu1 %v146_v52  ;;  %150 = vadd.xlane.f32.xlu0 %v149_v55  ;;  %v249_v55 = vld [vmem:[#allocation7 + $0x30] sm:$0xff] }
  0xf0   :  { %153 = vadd.xlane.f32.xlu1 %v152_v56  ;;  %v250_v56 = vld [vmem:[#allocation7 + $0x38] sm:$0xff] }
 0x101   :  { %253 = vperm.xlu1 %371, %v243_v57  }
 0x105   :  { %258 = vperm.xlu1 %371, %v244_v58  }
 0x109   :  { %263 = vperm.xlu1 %371, %v245_v59  }
 0x10d   :  { %268 = vperm.xlu1 %371, %v246_v60  }
 0x111   :  { %273 = vperm.xlu1 %371, %v247_v61  }
 0x16d   :  { %v133_v62 = vpop.xlane.xlu0 %132 }
 0x16e   :  { %v155_v63 = vmul.f32 0.03125, %v133_v62 }
 0x170   :  { %v171_v0 = vadd.f32 1e-05, %v155_v63 }
 0x171   :  { %v136_v1 = vpop.xlane.xlu1 %135  ;;  %v139_v2 = vpop.xlane.xlu0 %138 }
 0x172   :  { %373 = vrsqrt.f32 %v171_v0  ;;  %v156_v3 = vmul.f32 0.03125, %v136_v1  ;;  %v157_v4 = vmul.f32 0.03125, %v139_v2 }
 0x174   :  { %v172_v5 = vadd.f32 1e-05, %v156_v3  ;;  %v173_v6 = vadd.f32 1e-05, %v157_v4 }
 0x175   :  { %v142_v7 = vpop.xlane.xlu1 %141  ;;  %v145_v8 = vpop.xlane.xlu0 %144 }
 0x176   :  { %375 = vrsqrt.f32 %v172_v5  ;;  %v158_v9 = vmul.f32 0.03125, %v142_v7  ;;  %v159_v11 = vmul.f32 0.03125, %v145_v8  ;;  %v308_v8 = vld [vmem:[#allocation8 + $0x8] sm:$0xff] }
 0x177   :  { %377 = vrsqrt.f32 %v173_v6 }
 0x178   :  { %v174_v10 = vadd.f32 1e-05, %v158_v9  ;;  %v175_v19 = vadd.f32 1e-05, %v159_v11  ;;  %v307_v9 = vld [vmem:[#allocation8] sm:$0xff]  ;;  %v309_v11 = vld [vmem:[#allocation8 + $0x10] sm:$0xff] }
 0x179   :  { %v148_v12 = vpop.xlane.xlu1 %147  ;;  %v151_v13 = vpop.xlane.xlu0 %150 }
 0x17a   :  { %v160_v14 = vmul.f32 0.03125, %v148_v12  ;;  %v161_v15 = vmul.f32 0.03125, %v151_v13  ;;  %379 = vrsqrt.f32 %v174_v10 }
 0x17c   :  { %v374_v17 = vpop.eup %373  ;;  %v176_v18 = vadd.f32 1e-05, %v160_v14  ;;  %v177_v20 = vadd.f32 1e-05, %v161_v15 }
 0x17d   :  { %v187_v23 = vmul.f32 %v374_v17, %v163_v16  ;;  %v154_v24 = vpop.xlane.xlu1 %153 }
 0x17e   :  { %381 = vrsqrt.f32 %v176_v18  ;;  %v162_v25 = vmul.f32 0.03125, %v154_v24  ;;  %v310_v18 = vld [vmem:[#allocation8 + $0x18] sm:$0xff] }
 0x17f   :  { %383 = vrsqrt.f32 %v177_v20  ;;  %197 = vperm.xlu0 %372, %v187_v23  }
 0x180   :  { %v376_v27 = vpop.eup %375  ;;  %385 = vrsqrt.f32 %v175_v19  ;;  %v178_v28 = vadd.f32 1e-05, %v162_v25 }
 0x181   :  { %v188_v31 = vmul.f32 %v376_v27, %v164_v26  ;;  %v378_v32 = vpop.eup %377  ;;  %v254_v57 = vpop.permute.xlu1 %253 }
 0x182   :  { %387 = vrsqrt.f32 %v178_v28  ;;  %v189_v34 = vmul.f32 %v378_v32, %v165_v33  ;;  %v311_v32 = vld [vmem:[#allocation8 + $0x20] sm:$0xff] }
 0x183   :  { %202 = vperm.xlu1 %371, %v188_v31  }
 0x184   :  { %v380_v35 = vpop.eup %379 }
 0x185   :  { %v190_v44 = vmul.f32 %v380_v35, %v166_v37  ;;  %v259_v58 = vpop.permute.xlu1 %258 }
 0x187   :  { %207 = vperm.xlu1 %371, %v189_v34  }
 0x188   :  { %v382_v38 = vpop.eup %381 }
 0x189   :  { %v384_v42 = vpop.eup %383  ;;  %v192_v43 = vmul.f32 %v382_v38, %v168_v36  ;;  %v264_v59 = vpop.permute.xlu1 %263 }
 0x18a   :  { %v386_v45 = vpop.eup %385  ;;  %v193_v47 = vmul.f32 %v384_v42, %v169_v40  ;;  %v312_v40 = vld [vmem:[#allocation8 + $0x28] sm:$0xff] }
 0x18b   :  { %222 = vperm.xlu0 %372, %v192_v43   ;;  %212 = vperm.xlu1 %371, %v190_v44   ;;  %v191_v52 = vmul.f32 %v386_v45, %v167_v46 }
 0x18c   :  { %v388_v48 = vpop.eup %387 }
 0x18d   :  { %v194_v53 = vmul.f32 %v388_v48, %v170_v51  ;;  %v269_v60 = vpop.permute.xlu1 %268 }
 0x18f   :  { %217 = vperm.xlu1 %371, %v191_v52   ;;  %227 = vperm.xlu0 %372, %v193_v47  }
 0x191   :  { %v274_v61 = vpop.permute.xlu1 %273 }
 0x193   :  { %278 = vperm.xlu1 %371, %v248_v54   ;;  %232 = vperm.xlu0 %372, %v194_v53   ;;  %v313_v54 = vld [vmem:[#allocation8 + $0x30] sm:$0xff] }
 0x197   :  { %283 = vperm.xlu1 %371, %v249_v55   ;;  %288 = vperm.xlu0 %372, %v250_v56   ;;  %v314_v55 = vld [vmem:[#allocation8 + $0x38] sm:$0xff] }
 0x1fe   :  { %v198_v62 = vpop.permute.xlu0 %197 }
 0x1ff   :  { %v235_v63 = vmul.f32 %v198_v62, %v622_v21 }
 0x201   :  { %v291_v2 = vadd.f32 %v254_v57, %v235_v63 }
 0x202   :  { %v203_v0 = vpop.permute.xlu1 %202 }
 0x203   :  { %v236_v1 = vmul.f32 %v203_v0, %v630_v29  ;;  %v299_v7 = vmax.f32 %v291_v2, 0.0 }
 0x205   :  { %v292_v3 = vadd.f32 %v259_v58, %v236_v1  ;;  %v315_v16 = vmul.f32 %v307_v9, %v299_v7 }
 0x206   :  { %v208_v4 = vpop.permute.xlu1 %207 }
 0x207   :  { %v300_v5 = vmax.f32 %v292_v3, 0.0  ;;  %v237_v6 = vmul.f32 %v208_v4, %v624_v22  ;;  %v323_v25 = vsel %vm81_vm0, %v315_v16, 0.0 }
 0x209   :  { %v293_v10 = vadd.f32 %v264_v59, %v237_v6  ;;  %v316_v14 = vmul.f32 %v308_v8, %v300_v5 }
 0x20a   :  { %v213_v12 = vpop.permute.xlu1 %212  ;;  %v223_v13 = vpop.permute.xlu0 %222 }
 0x20b   :  { %v301_v15 = vmax.f32 %v293_v10, 0.0  ;;  %v238_v21 = vmul.f32 %v213_v12, %v632_v30  ;;  %v324_v23 = vsel %vm81_vm0, %v316_v14, 0.0  ;;  %v240_v28 = vmul.f32 %v223_v13, %v640_v39 }
 0x20c   :  { %v325_v30 = vadd.f32 %v324_v23, %v323_v25 }
 0x20d   :  { %v317_v17 = vmul.f32 %v309_v11, %v301_v15  ;;  %v294_v29 = vadd.f32 %v269_v60, %v238_v21 }
 0x20e   :  { %v218_v19 = vpop.permute.xlu1 %217  ;;  %v228_v20 = vpop.permute.xlu0 %227 }
 0x20f   :  { %v302_v22 = vmax.f32 %v294_v29, 0.0  ;;  %v239_v24 = vmul.f32 %v218_v19, %v643_v41  ;;  %v326_v26 = vsel %vm81_vm0, %v317_v17, 0.0  ;;  %v241_v41 = vmul.f32 %v228_v20, %v650_v49 }
 0x210   :  { %v327_v38 = vadd.f32 %v326_v26, %v325_v30 }
 0x211   :  { %v318_v27 = vmul.f32 %v310_v18, %v302_v22  ;;  %v295_v31 = vadd.f32 %v274_v61, %v239_v24 }
 0x212   :  { %v279_v33 = vpop.permute.xlu1 %278  ;;  %v233_v34 = vpop.permute.xlu0 %232 }
 0x213   :  { %v328_v35 = vsel %vm81_vm0, %v318_v27, 0.0  ;;  %v303_v36 = vmax.f32 %v295_v31, 0.0  ;;  %v296_v37 = vadd.f32 %v279_v33, %v240_v28  ;;  %v242_v44 = vmul.f32 %v233_v34, %v652_v50 }
 0x214   :  { %v329_v45 = vadd.f32 %v328_v35, %v327_v38 }
 0x215   :  { %v319_v42 = vmul.f32 %v311_v32, %v303_v36  ;;  %v304_v43 = vmax.f32 %v296_v37, 0.0 }
 0x216   :  { %v284_v46 = vpop.permute.xlu1 %283  ;;  %v289_v39 = vpop.permute.xlu0 %288 }
 0x217   :  { %v330_v47 = vsel %vm81_vm0, %v319_v42, 0.0  ;;  %v320_v48 = vmul.f32 %v312_v40, %v304_v43  ;;  %v297_v51 = vadd.f32 %v284_v46, %v241_v41  ;;  %v298_v52 = vadd.f32 %v289_v39, %v242_v44 }
 0x218   :  { %v331_v53 = vadd.f32 %v330_v47, %v329_v45 }
 0x219   :  { %v332_v56 = vsel %vm81_vm0, %v320_v48, 0.0  ;;  %v305_v57 = vmax.f32 %v297_v51, 0.0  ;;  %v306_v58 = vmax.f32 %v298_v52, 0.0 }
 0x21a   :  { %v333_v60 = vadd.f32 %v332_v56, %v331_v53 }
 0x21b   :  { %v321_v59 = vmul.f32 %v313_v54, %v305_v57  ;;  %v322_v49 = vmul.f32 %v314_v55, %v306_v58 }
 0x21d   :  { %v334_v50 = vsel %vm81_vm0, %v321_v59, 0.0  ;;  %v336_v62 = vsel %vm81_vm0, %v322_v49, 0.0 }
 0x21e   :  { %v335_v61 = vadd.f32 %v334_v50, %v333_v60 }
 0x220   :  { %v337_v63 = vadd.f32 %v336_v62, %v335_v61 }
 0x222   :  { %v338_v0 = vrot.slane %v337_v63, 4 }
 0x224   :  { %v339_v1 = vadd.f32 %v338_v0, %v337_v63 }
 0x226   :  { %v340_v2 = vrot.slane %v339_v1, 2 }
 0x228   :  { %v341_v3 = vadd.f32 %v340_v2, %v339_v1 }
 0x22a   :  { %v342_v4 = vrot.slane %v341_v3, 1 }
 0x22c   :  { %v343_v5 = vadd.f32 %v342_v4, %v341_v3 }
 0x22e   :  { %345 = vst.msk [vmem:[#allocation10] sm:$0x1] %vm344_vm1, %v343_v5 }
 0x22f   :  { %488 = shalt.err (!%p485_p8)
}
 0x230   :  { %s489_s14 = scalar_lea.hbm %s694_s4, 16 }
 0x231   :  { %p490_p9 = scmp.ne.s32.totalorder %s694_s4, %s489_s14  ;;  %p493_p10 = scmp.lt.u32.totalorder %s489_s14, %s694_s4 }
 0x233   :  { %p495_p11 = pnand %p493_p10, %p490_p9 }
 0x235   :  { %498 = shalt.err (!%p495_p11)
}
 0x236   :  { %355 = dma.vmem_to_hbm [thread:$0]  %s353_s27, 16, %s694_s4, [#allocation4]  }
 0x237   :  { %505 = dma.done.wait [#allocation4], 16  }
 0x238   :  { %506 = vsyncadd [#allocation4], 4294967280 }
 0x239   :  { %359 = vsyncpa [#allocation3], 1 }
 0x23a   :  { %360 = vsyncpa [#allocation6], 1 }
 0x23b   :  { %361 = vsyncpa [#allocation9], 1 }
 0x23c   :  { %362 = vsyncpa [#allocation4], 1 }

</bundles_post_ra>
